<compile_context>
chip_gen: v5e
topology: v5e:2x2
jax: 0.10.0
libtpu: 0.0.40
codegen_flags: <defaults>
</compile_context>

<pallas_src>
import functools

import jax
import jax.numpy as jnp
from jax.experimental import pallas as pl
from jax.experimental.pallas import tpu as pltpu

BN_EPS = 1e-5

_VMEM = pl.BlockSpec(memory_space=pltpu.MemorySpace.VMEM)


# ---------------------------------------------------------------------------
# Shared building blocks (traced inside kernels)
# ---------------------------------------------------------------------------
def _sigmoid_bn(pre, g_ref, beta_ref):
    """Sigmoid -> BatchNorm1d (training mode: batch stats, biased variance)."""
    h = jax.nn.sigmoid(pre)
    mean = jnp.mean(h, axis=0, keepdims=True)
    var = jnp.mean((h - mean) ** 2, axis=0, keepdims=True)
    h = (h - mean) * jax.lax.rsqrt(var + BN_EPS)
    return h * g_ref[...] + beta_ref[...]


def _linear_sigmoid_bn(x, w_ref, b_ref, g_ref, beta_ref):
    pre = jnp.dot(x, w_ref[...], preferred_element_type=jnp.float32) + b_ref[...]
    return _sigmoid_bn(pre, g_ref, beta_ref)


def _gru_step(x_t, h_prev, wi, wh, bi, bh, h_dim):
    """One torch.nn.GRU cell step with packed [W_r|W_z|W_n] gate weights."""
    gi = jnp.dot(x_t, wi, preferred_element_type=jnp.float32) + bi        # (B, 3H)
    gh = jnp.dot(h_prev, wh, preferred_element_type=jnp.float32) + bh     # (B, 3H)
    r = jax.nn.sigmoid(gi[:, :h_dim] + gh[:, :h_dim])
    z = jax.nn.sigmoid(gi[:, h_dim:2 * h_dim] + gh[:, h_dim:2 * h_dim])
    # NOTE: b_hn lives inside gh, so r multiplies (h@W_hn + b_hn) exactly as torch.
    n = jnp.tanh(gi[:, 2 * h_dim:] + r * gh[:, 2 * h_dim:])
    return (1.0 - z) * n + z * h_prev


# ---------------------------------------------------------------------------
# Kernel A:  fc MLP  +  bidirectional GRU (interleaved, fully unrolled)
# ---------------------------------------------------------------------------
def _fc_bigru_kernel(x_ref,
                     fw1, fb1, fg, fbt, fw2, fb2,
                     wif_r, whf_r, bif_r, bhf_r,
                     wib_r, whb_r, bib_r, bhb_r,
                     h0f_ref, h0b_ref,
                     *, n_time, n_batch, h_dim):
    # ---- self.fc over all n_time*n_batch rows (BN over the flattened batch) ----
    h = _linear_sigmoid_bn(x_ref[...], fw1, fb1, fg, fbt)
    h_all = jnp.dot(h, fw2[...], preferred_element_type=jnp.float32) + fb2[...]

    # Load weights once; they stay in vregs/VMEM across the unrolled loop.
    wif, whf, bif, bhf = wif_r[...], whf_r[...], bif_r[...], bhf_r[...]
    wib, whb, bib, bhb = wib_r[...], whb_r[...], bib_r[...], bhb_r[...]

    hf = jnp.zeros((n_batch, h_dim), jnp.float32)
    hb = jnp.zeros((n_batch, h_dim), jnp.float32)

    # Fully unrolled time loop; the independent fwd/bwd recurrences are
    # interleaved so the scheduler can overlap their MXU/EUP chains.
    for t in range(n_time):
        tb = n_time - 1 - t
        xf = h_all[t * n_batch:(t + 1) * n_batch, :]
        xb = h_all[tb * n_batch:(tb + 1) * n_batch, :]
        hf = _gru_step(xf, hf, wif, whf, bif, bhf, h_dim)
        hb = _gru_step(xb, hb, wib, whb, bib, bhb, h_dim)
        # The forward only consumes bi_out[:, 0]  ->  store row 0 per step.
        h0f_ref[t:t + 1, :] = hf[0:1, :].astype(h0f_ref.dtype)
        h0b_ref[tb:tb + 1, :] = hb[0:1, :].astype(h0b_ref.dtype)


def fc_bigru(x_flat, fc_p, gru_f, gru_b, *, n_time, n_batch, h_dim):
    kern = functools.partial(_fc_bigru_kernel,
                             n_time=n_time, n_batch=n_batch, h_dim=h_dim)
    return pl.pallas_call(
        kern,
        out_shape=(jax.ShapeDtypeStruct((n_time, h_dim), jnp.float32),
                   jax.ShapeDtypeStruct((n_time, h_dim), jnp.float32)),
        in_specs=[_VMEM] * 15,
        out_specs=(_VMEM, _VMEM),
    )(x_flat, *fc_p, *gru_f, *gru_b)


# ---------------------------------------------------------------------------
# Kernel B:  p_xi -> fused (mu|sigma) -> rsample -> p_lambda
# ---------------------------------------------------------------------------
def _head_kernel(h0f_ref, h0b_ref, eps_ref,
                 xw1a, xw1b, xb1, xg, xbt, xw2, xb2,
                 msw1, msb1, msg, msbt, mw2, mb2, sw2, sb2,
                 lw1, lb1, lg, lbt, lw2, lb2,
                 z_ref, mu_ref, sigma_ref,
                 *, h_dim):
    # ---- p_xi on concat([fwd, bwd]) expressed as two dots (no concat needed) ----
    pre = (jnp.dot(h0f_ref[...], xw1a[...], preferred_element_type=jnp.float32)
           + jnp.dot(h0b_ref[...], xw1b[...], preferred_element_type=jnp.float32)
           + xb1[...])
    h = _sigmoid_bn(pre, xg, xbt)
    hxi = jnp.dot(h, xw2[...], preferred_element_type=jnp.float32) + xb2[...]

    # ---- fused mu|sigma first layer (per-feature BN stats unchanged by concat) ----
    hms = _linear_sigmoid_bn(hxi, msw1, msb1, msg, msbt)           # (N, 2H)
    mu = (jnp.dot(hms[:, :h_dim], mw2[...], preferred_element_type=jnp.float32)
          + mb2[...])
    s_pre = (jnp.dot(hms[:, h_dim:], sw2[...], preferred_element_type=jnp.float32)
             + sb2[...])
    # PyTorch Softplus(beta=1, threshold=20)
    sigma = jnp.where(s_pre > 20.0, s_pre,
                      jnp.log1p(jnp.exp(jnp.minimum(s_pre, 20.0))))

    # ---- Normal(mu, sigma).rsample() == mu + sigma * eps ----
    w = mu + sigma * eps_ref[...]

    # ---- p_lambda ----
    hl = _linear_sigmoid_bn(w, lw1, lb1, lg, lbt)
    z = jnp.dot(hl, lw2[...], preferred_element_type=jnp.float32) + lb2[...]

    z_ref[...] = z.astype(z_ref.dtype)
    mu_ref[...] = mu.astype(mu_ref.dtype)
    sigma_ref[...] = sigma.astype(sigma_ref.dtype)


def head(h0f, h0b, eps, pxi, musigma, plam, *, h_dim, w_dim, z_dim):
    n = h0f.shape[0]
    kern = functools.partial(_head_kernel, h_dim=h_dim)
    return pl.pallas_call(
        kern,
        out_shape=(jax.ShapeDtypeStruct((n, z_dim), jnp.float32),
                   jax.ShapeDtypeStruct((n, w_dim), jnp.float32),
                   jax.ShapeDtypeStruct((n, w_dim), jnp.float32)),
        in_specs=[_VMEM] * 24,
        out_specs=(_VMEM, _VMEM, _VMEM),
    )(h0f, h0b, eps, *pxi, *musigma, *plam)


# ---------------------------------------------------------------------------
# Generator forward (two fused Pallas kernels, no intermediate HBM traffic
# besides the tiny (batch, H) GRU summaries between the two calls)
# ---------------------------------------------------------------------------
@functools.partial(jax.jit, static_argnames=("h_dim", "w_dim", "z_dim"))
def generator_forward(x, eps, params, *, h_dim, w_dim, z_dim):
    batch, seq, x_dim = x.shape
    h0f, h0b = fc_bigru(x.reshape(-1, x_dim),
                        params["fc"], params["gru_fwd"], params["gru_bwd"],
                        n_time=batch, n_batch=seq, h_dim=h_dim)
    z, mu, sigma = head(h0f, h0b, eps,
                        params["p_xi"], params["musigma"], params["p_lambda"],
                        h_dim=h_dim, w_dim=w_dim, z_dim=z_dim)
    return z, (mu, sigma)


# ---------------------------------------------------------------------------
# Deterministic parameter construction (shapes match the PyTorch module,
# stored pre-packed/transposed for the kernels)
# ---------------------------------------------------------------------------
def init_linear(key, in_dim, out_dim, scale=0.1):
    kw, kb = jax.random.split(key)
    w = scale * jax.random.normal(kw, (in_dim, out_dim), jnp.float32)
    b = scale * jax.random.normal(kb, (1, out_dim), jnp.float32)
    return w, b


def init_mlp(key, in_dim, h_dim, out_dim):
    k1, k2 = jax.random.split(key)
    w1, b1 = init_linear(k1, in_dim, h_dim)
    gamma = jnp.ones((1, h_dim), jnp.float32)    # BatchNorm1d weight
    beta = jnp.zeros((1, h_dim), jnp.float32)    # BatchNorm1d bias
    w2, b2 = init_linear(k2, h_dim, out_dim)
    return (w1, b1, gamma, beta, w2, b2)


def init_gru_dir(key, h_dim, scale=0.1):
    """Packed GRU params: Wi=[W_ir|W_iz|W_in]ᵀ, Wh=[W_hr|W_hz|W_hn]ᵀ, bi, bh."""
    kwi, kwh, kbi, kbh = jax.random.split(key, 4)
    wi = scale * jax.random.normal(kwi, (h_dim, 3 * h_dim), jnp.float32)
    wh = scale * jax.random.normal(kwh, (h_dim, 3 * h_dim), jnp.float32)
    bi = scale * jax.random.normal(kbi, (1, 3 * h_dim), jnp.float32)
    bh = scale * jax.random.normal(kbh, (1, 3 * h_dim), jnp.float32)
    return (wi, wh, bi, bh)


def pack_pxi(p, h_dim):
    """Split the (2H, H) first-layer weight so the kernel needs no concat."""
    w1, b1, g, bt, w2, b2 = p
    return (w1[:h_dim], w1[h_dim:], b1, g, bt, w2, b2)


def fuse_mu_sigma(mu_p, sig_p):
    """Fuse the mu and sigma first layers along the feature dim (exact)."""
    mw1, mb1, mg, mbt, mw2, mb2 = mu_p
    sw1, sb1, sg, sbt, sw2, sb2 = sig_p
    return (jnp.concatenate([mw1, sw1], axis=1),
            jnp.concatenate([mb1, sb1], axis=1),
            jnp.concatenate([mg, sg], axis=1),
            jnp.concatenate([mbt, sbt], axis=1),
            mw2, mb2, sw2, sb2)


if __name__ == "__main__":
    # Generator(z_dim, h_dim, x_dim, w_dim, T)
    z_dim, h_dim, x_dim, w_dim, T = 8, 32, 16, 8, 8
    batch, seq = 4, 8

    key = jax.random.PRNGKey(0)
    k_x, k_eps, k_params = jax.random.split(key, 3)
    pk = jax.random.split(k_params, 7)

    params = {
        "fc":       init_mlp(pk[0], x_dim, h_dim, h_dim),
        "gru_fwd":  init_gru_dir(pk[1], h_dim),
        "gru_bwd":  init_gru_dir(pk[2], h_dim),
        "p_xi":     pack_pxi(init_mlp(pk[3], 2 * h_dim, h_dim, h_dim), h_dim),
        "musigma":  fuse_mu_sigma(init_mlp(pk[4], h_dim, h_dim, w_dim),
                                  init_mlp(pk[5], h_dim, h_dim, w_dim)),
        "p_lambda": init_mlp(pk[6], w_dim, h_dim, z_dim),
    }

    x = jax.random.normal(k_x, (batch, seq, x_dim), jnp.float32)
    eps = jax.random.normal(k_eps, (batch, w_dim), jnp.float32)  # rsample noise

    z, (mu, sigma) = generator_forward(x, eps, params,
                                       h_dim=h_dim, w_dim=w_dim, z_dim=z_dim)
    jax.block_until_ready((z, mu, sigma))

    assert z.shape == (batch, z_dim)
    assert mu.shape == (batch, w_dim)
    assert sigma.shape == (batch, w_dim)
    assert bool(jnp.all(sigma > 0.0))  # softplus output must be positive
    print("KERNEL_OK")
</pallas_src>

<mosaic_0001>
module attributes {stable_mosaic.version = 11 : i64} {
  func.func @_head_kernel(%arg0: memref<4x32xf32, #tpu.memory_space<vmem>>, %arg1: memref<4x32xf32, #tpu.memory_space<vmem>>, %arg2: memref<4x8xf32, #tpu.memory_space<vmem>>, %arg3: memref<32x32xf32, #tpu.memory_space<vmem>>, %arg4: memref<32x32xf32, #tpu.memory_space<vmem>>, %arg5: memref<1x32xf32, #tpu.memory_space<vmem>>, %arg6: memref<1x32xf32, #tpu.memory_space<vmem>>, %arg7: memref<1x32xf32, #tpu.memory_space<vmem>>, %arg8: memref<32x32xf32, #tpu.memory_space<vmem>>, %arg9: memref<1x32xf32, #tpu.memory_space<vmem>>, %arg10: memref<32x64xf32, #tpu.memory_space<vmem>>, %arg11: memref<1x64xf32, #tpu.memory_space<vmem>>, %arg12: memref<1x64xf32, #tpu.memory_space<vmem>>, %arg13: memref<1x64xf32, #tpu.memory_space<vmem>>, %arg14: memref<32x8xf32, #tpu.memory_space<vmem>>, %arg15: memref<1x8xf32, #tpu.memory_space<vmem>>, %arg16: memref<32x8xf32, #tpu.memory_space<vmem>>, %arg17: memref<1x8xf32, #tpu.memory_space<vmem>>, %arg18: memref<8x32xf32, #tpu.memory_space<vmem>>, %arg19: memref<1x32xf32, #tpu.memory_space<vmem>>, %arg20: memref<1x32xf32, #tpu.memory_space<vmem>>, %arg21: memref<1x32xf32, #tpu.memory_space<vmem>>, %arg22: memref<32x8xf32, #tpu.memory_space<vmem>>, %arg23: memref<1x8xf32, #tpu.memory_space<vmem>>, %arg24: memref<4x8xf32, #tpu.memory_space<vmem>>, %arg25: memref<4x8xf32, #tpu.memory_space<vmem>>, %arg26: memref<4x8xf32, #tpu.memory_space<vmem>>) attributes {dimension_semantics = [], scalar_prefetch = 0 : i64, scratch_operands = 0 : i64, tpu.core_type = #tpu.core_type<tc>} {
    %c0 = arith.constant 0 : index
    %c0_0 = arith.constant 0 : index
    %0 = vector.load %arg0[%c0, %c0_0] : memref<4x32xf32, #tpu.memory_space<vmem>>, vector<4x32xf32>
    %c0_1 = arith.constant 0 : index
    %c0_2 = arith.constant 0 : index
    %1 = vector.load %arg3[%c0_1, %c0_2] : memref<32x32xf32, #tpu.memory_space<vmem>>, vector<32x32xf32>
    %cst = arith.constant dense<0.000000e+00> : vector<4x32xf32>
    %2 = tpu.matmul %0, %1, %cst {dimension_numbers = #tpu.dot_dimension_numbers<[1], [0], [0], [1], [0, 0, 1, 1], [], []>} : vector<4x32xf32>, vector<32x32xf32>, vector<4x32xf32> -> vector<4x32xf32>
    %c0_3 = arith.constant 0 : index
    %c0_4 = arith.constant 0 : index
    %3 = vector.load %arg1[%c0_3, %c0_4] : memref<4x32xf32, #tpu.memory_space<vmem>>, vector<4x32xf32>
    %c0_5 = arith.constant 0 : index
    %c0_6 = arith.constant 0 : index
    %4 = vector.load %arg4[%c0_5, %c0_6] : memref<32x32xf32, #tpu.memory_space<vmem>>, vector<32x32xf32>
    %cst_7 = arith.constant dense<0.000000e+00> : vector<4x32xf32>
    %5 = tpu.matmul %3, %4, %cst_7 {dimension_numbers = #tpu.dot_dimension_numbers<[1], [0], [0], [1], [0, 0, 1, 1], [], []>} : vector<4x32xf32>, vector<32x32xf32>, vector<4x32xf32> -> vector<4x32xf32>
    %6 = arith.addf %2, %5 : vector<4x32xf32>
    %c0_8 = arith.constant 0 : index
    %c0_9 = arith.constant 0 : index
    %7 = vector.load %arg5[%c0_8, %c0_9] : memref<1x32xf32, #tpu.memory_space<vmem>>, vector<1x32xf32>
    %8 = vector.broadcast %7 : vector<1x32xf32> to vector<4x32xf32>
    %9 = arith.addf %6, %8 : vector<4x32xf32>
    %10 = arith.negf %9 : vector<4x32xf32>
    %11 = math.exp %10 : vector<4x32xf32>
    %cst_10 = arith.constant 1.000000e+00 : f32
    %12 = vector.broadcast %cst_10 : f32 to vector<4x32xf32>
    %13 = arith.addf %12, %11 : vector<4x32xf32>
    %14 = arith.divf %12, %13 : vector<4x32xf32>
    %cst_11 = arith.constant dense<0.000000e+00> : vector<32xf32>
    %15 = vector.multi_reduction <add>, %14, %cst_11 [0] : vector<4x32xf32> to vector<32xf32>
    %16 = vector.shape_cast %15 : vector<32xf32> to vector<1x32xf32>
    %cst_12 = arith.constant 4.000000e+00 : f32
    %17 = vector.broadcast %cst_12 : f32 to vector<1x32xf32>
    %18 = arith.divf %16, %17 : vector<1x32xf32>
    %19 = vector.broadcast %18 : vector<1x32xf32> to vector<4x32xf32>
    %20 = arith.subf %14, %19 : vector<4x32xf32>
    %21 = arith.mulf %20, %20 : vector<4x32xf32>
    %cst_13 = arith.constant dense<0.000000e+00> : vector<32xf32>
    %22 = vector.multi_reduction <add>, %21, %cst_13 [0] : vector<4x32xf32> to vector<32xf32>
    %23 = vector.shape_cast %22 : vector<32xf32> to vector<1x32xf32>
    %cst_14 = arith.constant 4.000000e+00 : f32
    %24 = vector.broadcast %cst_14 : f32 to vector<1x32xf32>
    %25 = arith.divf %23, %24 : vector<1x32xf32>
    %26 = vector.broadcast %18 : vector<1x32xf32> to vector<4x32xf32>
    %27 = arith.subf %14, %26 : vector<4x32xf32>
    %cst_15 = arith.constant 9.99999974E-6 : f32
    %28 = vector.broadcast %cst_15 : f32 to vector<1x32xf32>
    %29 = arith.addf %25, %28 : vector<1x32xf32>
    %30 = math.rsqrt %29 : vector<1x32xf32>
    %31 = vector.broadcast %30 : vector<1x32xf32> to vector<4x32xf32>
    %32 = arith.mulf %27, %31 : vector<4x32xf32>
    %c0_16 = arith.constant 0 : index
    %c0_17 = arith.constant 0 : index
    %33 = vector.load %arg6[%c0_16, %c0_17] : memref<1x32xf32, #tpu.memory_space<vmem>>, vector<1x32xf32>
    %34 = vector.broadcast %33 : vector<1x32xf32> to vector<4x32xf32>
    %35 = arith.mulf %32, %34 : vector<4x32xf32>
    %c0_18 = arith.constant 0 : index
    %c0_19 = arith.constant 0 : index
    %36 = vector.load %arg7[%c0_18, %c0_19] : memref<1x32xf32, #tpu.memory_space<vmem>>, vector<1x32xf32>
    %37 = vector.broadcast %36 : vector<1x32xf32> to vector<4x32xf32>
    %38 = arith.addf %35, %37 : vector<4x32xf32>
    %c0_20 = arith.constant 0 : index
    %c0_21 = arith.constant 0 : index
    %39 = vector.load %arg8[%c0_20, %c0_21] : memref<32x32xf32, #tpu.memory_space<vmem>>, vector<32x32xf32>
    %cst_22 = arith.constant dense<0.000000e+00> : vector<4x32xf32>
    %40 = tpu.matmul %38, %39, %cst_22 {dimension_numbers = #tpu.dot_dimension_numbers<[1], [0], [0], [1], [0, 0, 1, 1], [], []>} : vector<4x32xf32>, vector<32x32xf32>, vector<4x32xf32> -> vector<4x32xf32>
    %c0_23 = arith.constant 0 : index
    %c0_24 = arith.constant 0 : index
    %41 = vector.load %arg9[%c0_23, %c0_24] : memref<1x32xf32, #tpu.memory_space<vmem>>, vector<1x32xf32>
    %42 = vector.broadcast %41 : vector<1x32xf32> to vector<4x32xf32>
    %43 = arith.addf %40, %42 : vector<4x32xf32>
    %c0_25 = arith.constant 0 : index
    %c0_26 = arith.constant 0 : index
    %44 = vector.load %arg10[%c0_25, %c0_26] : memref<32x64xf32, #tpu.memory_space<vmem>>, vector<32x64xf32>
    %cst_27 = arith.constant dense<0.000000e+00> : vector<4x64xf32>
    %45 = tpu.matmul %43, %44, %cst_27 {dimension_numbers = #tpu.dot_dimension_numbers<[1], [0], [0], [1], [0, 0, 1, 1], [], []>} : vector<4x32xf32>, vector<32x64xf32>, vector<4x64xf32> -> vector<4x64xf32>
    %c0_28 = arith.constant 0 : index
    %c0_29 = arith.constant 0 : index
    %46 = vector.load %arg11[%c0_28, %c0_29] : memref<1x64xf32, #tpu.memory_space<vmem>>, vector<1x64xf32>
    %47 = vector.broadcast %46 : vector<1x64xf32> to vector<4x64xf32>
    %48 = arith.addf %45, %47 : vector<4x64xf32>
    %49 = arith.negf %48 : vector<4x64xf32>
    %50 = math.exp %49 : vector<4x64xf32>
    %cst_30 = arith.constant 1.000000e+00 : f32
    %51 = vector.broadcast %cst_30 : f32 to vector<4x64xf32>
    %52 = arith.addf %51, %50 : vector<4x64xf32>
    %53 = arith.divf %51, %52 : vector<4x64xf32>
    %cst_31 = arith.constant dense<0.000000e+00> : vector<64xf32>
    %54 = vector.multi_reduction <add>, %53, %cst_31 [0] : vector<4x64xf32> to vector<64xf32>
    %55 = vector.shape_cast %54 : vector<64xf32> to vector<1x64xf32>
    %cst_32 = arith.constant 4.000000e+00 : f32
    %56 = vector.broadcast %cst_32 : f32 to vector<1x64xf32>
    %57 = arith.divf %55, %56 : vector<1x64xf32>
    %58 = vector.broadcast %57 : vector<1x64xf32> to vector<4x64xf32>
    %59 = arith.subf %53, %58 : vector<4x64xf32>
    %60 = arith.mulf %59, %59 : vector<4x64xf32>
    %cst_33 = arith.constant dense<0.000000e+00> : vector<64xf32>
    %61 = vector.multi_reduction <add>, %60, %cst_33 [0] : vector<4x64xf32> to vector<64xf32>
    %62 = vector.shape_cast %61 : vector<64xf32> to vector<1x64xf32>
    %cst_34 = arith.constant 4.000000e+00 : f32
    %63 = vector.broadcast %cst_34 : f32 to vector<1x64xf32>
    %64 = arith.divf %62, %63 : vector<1x64xf32>
    %65 = vector.broadcast %57 : vector<1x64xf32> to vector<4x64xf32>
    %66 = arith.subf %53, %65 : vector<4x64xf32>
    %cst_35 = arith.constant 9.99999974E-6 : f32
    %67 = vector.broadcast %cst_35 : f32 to vector<1x64xf32>
    %68 = arith.addf %64, %67 : vector<1x64xf32>
    %69 = math.rsqrt %68 : vector<1x64xf32>
    %70 = vector.broadcast %69 : vector<1x64xf32> to vector<4x64xf32>
    %71 = arith.mulf %66, %70 : vector<4x64xf32>
    %c0_36 = arith.constant 0 : index
    %c0_37 = arith.constant 0 : index
    %72 = vector.load %arg12[%c0_36, %c0_37] : memref<1x64xf32, #tpu.memory_space<vmem>>, vector<1x64xf32>
    %73 = vector.broadcast %72 : vector<1x64xf32> to vector<4x64xf32>
    %74 = arith.mulf %71, %73 : vector<4x64xf32>
    %c0_38 = arith.constant 0 : index
    %c0_39 = arith.constant 0 : index
    %75 = vector.load %arg13[%c0_38, %c0_39] : memref<1x64xf32, #tpu.memory_space<vmem>>, vector<1x64xf32>
    %76 = vector.broadcast %75 : vector<1x64xf32> to vector<4x64xf32>
    %77 = arith.addf %74, %76 : vector<4x64xf32>
    %78 = vector.extract_strided_slice %77 {offsets = [0, 0], sizes = [4, 32], strides = [1, 1]} : vector<4x64xf32> to vector<4x32xf32>
    %c0_40 = arith.constant 0 : index
    %c0_41 = arith.constant 0 : index
    %79 = vector.load %arg14[%c0_40, %c0_41] : memref<32x8xf32, #tpu.memory_space<vmem>>, vector<32x8xf32>
    %cst_42 = arith.constant dense<0.000000e+00> : vector<4x8xf32>
    %80 = tpu.matmul %78, %79, %cst_42 {dimension_numbers = #tpu.dot_dimension_numbers<[1], [0], [0], [1], [0, 0, 1, 1], [], []>} : vector<4x32xf32>, vector<32x8xf32>, vector<4x8xf32> -> vector<4x8xf32>
    %c0_43 = arith.constant 0 : index
    %c0_44 = arith.constant 0 : index
    %81 = vector.load %arg15[%c0_43, %c0_44] : memref<1x8xf32, #tpu.memory_space<vmem>>, vector<1x8xf32>
    %82 = vector.broadcast %81 : vector<1x8xf32> to vector<4x8xf32>
    %83 = arith.addf %80, %82 : vector<4x8xf32>
    %84 = vector.extract_strided_slice %77 {offsets = [0, 32], sizes = [4, 32], strides = [1, 1]} : vector<4x64xf32> to vector<4x32xf32>
    %c0_45 = arith.constant 0 : index
    %c0_46 = arith.constant 0 : index
    %85 = vector.load %arg16[%c0_45, %c0_46] : memref<32x8xf32, #tpu.memory_space<vmem>>, vector<32x8xf32>
    %cst_47 = arith.constant dense<0.000000e+00> : vector<4x8xf32>
    %86 = tpu.matmul %84, %85, %cst_47 {dimension_numbers = #tpu.dot_dimension_numbers<[1], [0], [0], [1], [0, 0, 1, 1], [], []>} : vector<4x32xf32>, vector<32x8xf32>, vector<4x8xf32> -> vector<4x8xf32>
    %c0_48 = arith.constant 0 : index
    %c0_49 = arith.constant 0 : index
    %87 = vector.load %arg17[%c0_48, %c0_49] : memref<1x8xf32, #tpu.memory_space<vmem>>, vector<1x8xf32>
    %88 = vector.broadcast %87 : vector<1x8xf32> to vector<4x8xf32>
    %89 = arith.addf %86, %88 : vector<4x8xf32>
    %cst_50 = arith.constant 2.000000e+01 : f32
    %90 = vector.broadcast %cst_50 : f32 to vector<4x8xf32>
    %91 = arith.cmpf ogt, %89, %90 : vector<4x8xf32>
    %cst_51 = arith.constant 2.000000e+01 : f32
    %92 = vector.broadcast %cst_51 : f32 to vector<4x8xf32>
    %93 = arith.minimumf %89, %92 : vector<4x8xf32>
    %94 = math.exp %93 : vector<4x8xf32>
    %95 = math.log1p %94 : vector<4x8xf32>
    %96 = arith.select %91, %89, %95 : vector<4x8xi1>, vector<4x8xf32>
    %c0_52 = arith.constant 0 : index
    %c0_53 = arith.constant 0 : index
    %97 = vector.load %arg2[%c0_52, %c0_53] : memref<4x8xf32, #tpu.memory_space<vmem>>, vector<4x8xf32>
    %98 = arith.mulf %96, %97 : vector<4x8xf32>
    %99 = arith.addf %83, %98 : vector<4x8xf32>
    %c0_54 = arith.constant 0 : index
    %c0_55 = arith.constant 0 : index
    %100 = vector.load %arg18[%c0_54, %c0_55] : memref<8x32xf32, #tpu.memory_space<vmem>>, vector<8x32xf32>
    %cst_56 = arith.constant dense<0.000000e+00> : vector<4x32xf32>
    %101 = tpu.matmul %99, %100, %cst_56 {dimension_numbers = #tpu.dot_dimension_numbers<[1], [0], [0], [1], [0, 0, 1, 1], [], []>} : vector<4x8xf32>, vector<8x32xf32>, vector<4x32xf32> -> vector<4x32xf32>
    %c0_57 = arith.constant 0 : index
    %c0_58 = arith.constant 0 : index
    %102 = vector.load %arg19[%c0_57, %c0_58] : memref<1x32xf32, #tpu.memory_space<vmem>>, vector<1x32xf32>
    %103 = vector.broadcast %102 : vector<1x32xf32> to vector<4x32xf32>
    %104 = arith.addf %101, %103 : vector<4x32xf32>
    %105 = arith.negf %104 : vector<4x32xf32>
    %106 = math.exp %105 : vector<4x32xf32>
    %cst_59 = arith.constant 1.000000e+00 : f32
    %107 = vector.broadcast %cst_59 : f32 to vector<4x32xf32>
    %108 = arith.addf %107, %106 : vector<4x32xf32>
    %109 = arith.divf %107, %108 : vector<4x32xf32>
    %cst_60 = arith.constant dense<0.000000e+00> : vector<32xf32>
    %110 = vector.multi_reduction <add>, %109, %cst_60 [0] : vector<4x32xf32> to vector<32xf32>
    %111 = vector.shape_cast %110 : vector<32xf32> to vector<1x32xf32>
    %cst_61 = arith.constant 4.000000e+00 : f32
    %112 = vector.broadcast %cst_61 : f32 to vector<1x32xf32>
    %113 = arith.divf %111, %112 : vector<1x32xf32>
    %114 = vector.broadcast %113 : vector<1x32xf32> to vector<4x32xf32>
    %115 = arith.subf %109, %114 : vector<4x32xf32>
    %116 = arith.mulf %115, %115 : vector<4x32xf32>
    %cst_62 = arith.constant dense<0.000000e+00> : vector<32xf32>
    %117 = vector.multi_reduction <add>, %116, %cst_62 [0] : vector<4x32xf32> to vector<32xf32>
    %118 = vector.shape_cast %117 : vector<32xf32> to vector<1x32xf32>
    %cst_63 = arith.constant 4.000000e+00 : f32
    %119 = vector.broadcast %cst_63 : f32 to vector<1x32xf32>
    %120 = arith.divf %118, %119 : vector<1x32xf32>
    %121 = vector.broadcast %113 : vector<1x32xf32> to vector<4x32xf32>
    %122 = arith.subf %109, %121 : vector<4x32xf32>
    %cst_64 = arith.constant 9.99999974E-6 : f32
    %123 = vector.broadcast %cst_64 : f32 to vector<1x32xf32>
    %124 = arith.addf %120, %123 : vector<1x32xf32>
    %125 = math.rsqrt %124 : vector<1x32xf32>
    %126 = vector.broadcast %125 : vector<1x32xf32> to vector<4x32xf32>
    %127 = arith.mulf %122, %126 : vector<4x32xf32>
    %c0_65 = arith.constant 0 : index
    %c0_66 = arith.constant 0 : index
    %128 = vector.load %arg20[%c0_65, %c0_66] : memref<1x32xf32, #tpu.memory_space<vmem>>, vector<1x32xf32>
    %129 = vector.broadcast %128 : vector<1x32xf32> to vector<4x32xf32>
    %130 = arith.mulf %127, %129 : vector<4x32xf32>
    %c0_67 = arith.constant 0 : index
    %c0_68 = arith.constant 0 : index
    %131 = vector.load %arg21[%c0_67, %c0_68] : memref<1x32xf32, #tpu.memory_space<vmem>>, vector<1x32xf32>
    %132 = vector.broadcast %131 : vector<1x32xf32> to vector<4x32xf32>
    %133 = arith.addf %130, %132 : vector<4x32xf32>
    %c0_69 = arith.constant 0 : index
    %c0_70 = arith.constant 0 : index
    %134 = vector.load %arg22[%c0_69, %c0_70] : memref<32x8xf32, #tpu.memory_space<vmem>>, vector<32x8xf32>
    %cst_71 = arith.constant dense<0.000000e+00> : vector<4x8xf32>
    %135 = tpu.matmul %133, %134, %cst_71 {dimension_numbers = #tpu.dot_dimension_numbers<[1], [0], [0], [1], [0, 0, 1, 1], [], []>} : vector<4x32xf32>, vector<32x8xf32>, vector<4x8xf32> -> vector<4x8xf32>
    %c0_72 = arith.constant 0 : index
    %c0_73 = arith.constant 0 : index
    %136 = vector.load %arg23[%c0_72, %c0_73] : memref<1x8xf32, #tpu.memory_space<vmem>>, vector<1x8xf32>
    %137 = vector.broadcast %136 : vector<1x8xf32> to vector<4x8xf32>
    %138 = arith.addf %135, %137 : vector<4x8xf32>
    %c0_74 = arith.constant 0 : index
    %c0_75 = arith.constant 0 : index
    %139 = vector.load %arg24[%c0_74, %c0_75] : memref<4x8xf32, #tpu.memory_space<vmem>>, vector<4x8xf32>
    tpu.vector_store %arg24[%c0_74, %c0_75], %138 {strides = array<i32>} : memref<4x8xf32, #tpu.memory_space<vmem>>, vector<4x8xf32>,
    %c0_76 = arith.constant 0 : index
    %c0_77 = arith.constant 0 : index
    %140 = vector.load %arg25[%c0_76, %c0_77] : memref<4x8xf32, #tpu.memory_space<vmem>>, vector<4x8xf32>
    tpu.vector_store %arg25[%c0_76, %c0_77], %83 {strides = array<i32>} : memref<4x8xf32, #tpu.memory_space<vmem>>, vector<4x8xf32>,
    %c0_78 = arith.constant 0 : index
    %c0_79 = arith.constant 0 : index
    %141 = vector.load %arg26[%c0_78, %c0_79] : memref<4x8xf32, #tpu.memory_space<vmem>>, vector<4x8xf32>
    tpu.vector_store %arg26[%c0_78, %c0_79], %96 {strides = array<i32>} : memref<4x8xf32, #tpu.memory_space<vmem>>, vector<4x8xf32>,
    return
  }
}

module attributes {stable_mosaic.version = 11 : i64} {
  func.func @_fc_bigru_kernel(%arg0: memref<32x16xf32, #tpu.memory_space<vmem>>, %arg1: memref<16x32xf32, #tpu.memory_space<vmem>>, %arg2: memref<1x32xf32, #tpu.memory_space<vmem>>, %arg3: memref<1x32xf32, #tpu.memory_space<vmem>>, %arg4: memref<1x32xf32, #tpu.memory_space<vmem>>, %arg5: memref<32x32xf32, #tpu.memory_space<vmem>>, %arg6: memref<1x32xf32, #tpu.memory_space<vmem>>, %arg7: memref<32x96xf32, #tpu.memory_space<vmem>>, %arg8: memref<32x96xf32, #tpu.memory_space<vmem>>, %arg9: memref<1x96xf32, #tpu.memory_space<vmem>>, %arg10: memref<1x96xf32, #tpu.memory_space<vmem>>, %arg11: memref<32x96xf32, #tpu.memory_space<vmem>>, %arg12: memref<32x96xf32, #tpu.memory_space<vmem>>, %arg13: memref<1x96xf32, #tpu.memory_space<vmem>>, %arg14: memref<1x96xf32, #tpu.memory_space<vmem>>, %arg15: memref<4x32xf32, #tpu.memory_space<vmem>>, %arg16: memref<4x32xf32, #tpu.memory_space<vmem>>) attributes {dimension_semantics = [], scalar_prefetch = 0 : i64, scratch_operands = 0 : i64, tpu.core_type = #tpu.core_type<tc>} {
    %c0 = arith.constant 0 : index
    %c0_0 = arith.constant 0 : index
    %0 = vector.load %arg0[%c0, %c0_0] : memref<32x16xf32, #tpu.memory_space<vmem>>, vector<32x16xf32>
    %c0_1 = arith.constant 0 : index
    %c0_2 = arith.constant 0 : index
    %1 = vector.load %arg1[%c0_1, %c0_2] : memref<16x32xf32, #tpu.memory_space<vmem>>, vector<16x32xf32>
    %cst = arith.constant dense<0.000000e+00> : vector<32x32xf32>
    %2 = tpu.matmul %0, %1, %cst {dimension_numbers = #tpu.dot_dimension_numbers<[1], [0], [0], [1], [0, 0, 1, 1], [], []>} : vector<32x16xf32>, vector<16x32xf32>, vector<32x32xf32> -> vector<32x32xf32>
    %c0_3 = arith.constant 0 : index
    %c0_4 = arith.constant 0 : index
    %3 = vector.load %arg2[%c0_3, %c0_4] : memref<1x32xf32, #tpu.memory_space<vmem>>, vector<1x32xf32>
    %4 = vector.broadcast %3 : vector<1x32xf32> to vector<32x32xf32>
    %5 = arith.addf %2, %4 : vector<32x32xf32>
    %6 = arith.negf %5 : vector<32x32xf32>
    %7 = math.exp %6 : vector<32x32xf32>
    %cst_5 = arith.constant 1.000000e+00 : f32
    %8 = vector.broadcast %cst_5 : f32 to vector<32x32xf32>
    %9 = arith.addf %8, %7 : vector<32x32xf32>
    %10 = arith.divf %8, %9 : vector<32x32xf32>
    %cst_6 = arith.constant dense<0.000000e+00> : vector<32xf32>
    %11 = vector.multi_reduction <add>, %10, %cst_6 [0] : vector<32x32xf32> to vector<32xf32>
    %12 = vector.shape_cast %11 : vector<32xf32> to vector<1x32xf32>
    %cst_7 = arith.constant 3.200000e+01 : f32
    %13 = vector.broadcast %cst_7 : f32 to vector<1x32xf32>
    %14 = arith.divf %12, %13 : vector<1x32xf32>
    %15 = vector.broadcast %14 : vector<1x32xf32> to vector<32x32xf32>
    %16 = arith.subf %10, %15 : vector<32x32xf32>
    %17 = arith.mulf %16, %16 : vector<32x32xf32>
    %cst_8 = arith.constant dense<0.000000e+00> : vector<32xf32>
    %18 = vector.multi_reduction <add>, %17, %cst_8 [0] : vector<32x32xf32> to vector<32xf32>
    %19 = vector.shape_cast %18 : vector<32xf32> to vector<1x32xf32>
    %cst_9 = arith.constant 3.200000e+01 : f32
    %20 = vector.broadcast %cst_9 : f32 to vector<1x32xf32>
    %21 = arith.divf %19, %20 : vector<1x32xf32>
    %22 = vector.broadcast %14 : vector<1x32xf32> to vector<32x32xf32>
    %23 = arith.subf %10, %22 : vector<32x32xf32>
    %cst_10 = arith.constant 9.99999974E-6 : f32
    %24 = vector.broadcast %cst_10 : f32 to vector<1x32xf32>
    %25 = arith.addf %21, %24 : vector<1x32xf32>
    %26 = math.rsqrt %25 : vector<1x32xf32>
    %27 = vector.broadcast %26 : vector<1x32xf32> to vector<32x32xf32>
    %28 = arith.mulf %23, %27 : vector<32x32xf32>
    %c0_11 = arith.constant 0 : index
    %c0_12 = arith.constant 0 : index
    %29 = vector.load %arg3[%c0_11, %c0_12] : memref<1x32xf32, #tpu.memory_space<vmem>>, vector<1x32xf32>
    %30 = vector.broadcast %29 : vector<1x32xf32> to vector<32x32xf32>
    %31 = arith.mulf %28, %30 : vector<32x32xf32>
    %c0_13 = arith.constant 0 : index
    %c0_14 = arith.constant 0 : index
    %32 = vector.load %arg4[%c0_13, %c0_14] : memref<1x32xf32, #tpu.memory_space<vmem>>, vector<1x32xf32>
    %33 = vector.broadcast %32 : vector<1x32xf32> to vector<32x32xf32>
    %34 = arith.addf %31, %33 : vector<32x32xf32>
    %c0_15 = arith.constant 0 : index
    %c0_16 = arith.constant 0 : index
    %35 = vector.load %arg5[%c0_15, %c0_16] : memref<32x32xf32, #tpu.memory_space<vmem>>, vector<32x32xf32>
    %cst_17 = arith.constant dense<0.000000e+00> : vector<32x32xf32>
    %36 = tpu.matmul %34, %35, %cst_17 {dimension_numbers = #tpu.dot_dimension_numbers<[1], [0], [0], [1], [0, 0, 1, 1], [], []>} : vector<32x32xf32>, vector<32x32xf32>, vector<32x32xf32> -> vector<32x32xf32>
    %c0_18 = arith.constant 0 : index
    %c0_19 = arith.constant 0 : index
    %37 = vector.load %arg6[%c0_18, %c0_19] : memref<1x32xf32, #tpu.memory_space<vmem>>, vector<1x32xf32>
    %38 = vector.broadcast %37 : vector<1x32xf32> to vector<32x32xf32>
    %39 = arith.addf %36, %38 : vector<32x32xf32>
    %c0_20 = arith.constant 0 : index
    %c0_21 = arith.constant 0 : index
    %40 = vector.load %arg7[%c0_20, %c0_21] : memref<32x96xf32, #tpu.memory_space<vmem>>, vector<32x96xf32>
    %c0_22 = arith.constant 0 : index
    %c0_23 = arith.constant 0 : index
    %41 = vector.load %arg8[%c0_22, %c0_23] : memref<32x96xf32, #tpu.memory_space<vmem>>, vector<32x96xf32>
    %c0_24 = arith.constant 0 : index
    %c0_25 = arith.constant 0 : index
    %42 = vector.load %arg9[%c0_24, %c0_25] : memref<1x96xf32, #tpu.memory_space<vmem>>, vector<1x96xf32>
    %c0_26 = arith.constant 0 : index
    %c0_27 = arith.constant 0 : index
    %43 = vector.load %arg10[%c0_26, %c0_27] : memref<1x96xf32, #tpu.memory_space<vmem>>, vector<1x96xf32>
    %c0_28 = arith.constant 0 : index
    %c0_29 = arith.constant 0 : index
    %44 = vector.load %arg11[%c0_28, %c0_29] : memref<32x96xf32, #tpu.memory_space<vmem>>, vector<32x96xf32>
    %c0_30 = arith.constant 0 : index
    %c0_31 = arith.constant 0 : index
    %45 = vector.load %arg12[%c0_30, %c0_31] : memref<32x96xf32, #tpu.memory_space<vmem>>, vector<32x96xf32>
    %c0_32 = arith.constant 0 : index
    %c0_33 = arith.constant 0 : index
    %46 = vector.load %arg13[%c0_32, %c0_33] : memref<1x96xf32, #tpu.memory_space<vmem>>, vector<1x96xf32>
    %c0_34 = arith.constant 0 : index
    %c0_35 = arith.constant 0 : index
    %47 = vector.load %arg14[%c0_34, %c0_35] : memref<1x96xf32, #tpu.memory_space<vmem>>, vector<1x96xf32>
    %cst_36 = arith.constant 0.000000e+00 : f32
    %48 = vector.broadcast %cst_36 : f32 to vector<8x32xf32>
    %cst_37 = arith.constant 0.000000e+00 : f32
    %49 = vector.broadcast %cst_37 : f32 to vector<8x32xf32>
    %50 = vector.extract_strided_slice %39 {offsets = [0, 0], sizes = [8, 32], strides = [1, 1]} : vector<32x32xf32> to vector<8x32xf32>
    %51 = vector.extract_strided_slice %39 {offsets = [24, 0], sizes = [8, 32], strides = [1, 1]} : vector<32x32xf32> to vector<8x32xf32>
    %cst_38 = arith.constant dense<0.000000e+00> : vector<8x96xf32>
    %52 = tpu.matmul %50, %40, %cst_38 {dimension_numbers = #tpu.dot_dimension_numbers<[1], [0], [0], [1], [0, 0, 1, 1], [], []>} : vector<8x32xf32>, vector<32x96xf32>, vector<8x96xf32> -> vector<8x96xf32>
    %53 = vector.broadcast %42 : vector<1x96xf32> to vector<8x96xf32>
    %54 = arith.addf %52, %53 : vector<8x96xf32>
    %cst_39 = arith.constant dense<0.000000e+00> : vector<8x96xf32>
    %55 = tpu.matmul %48, %41, %cst_39 {dimension_numbers = #tpu.dot_dimension_numbers<[1], [0], [0], [1], [0, 0, 1, 1], [], []>} : vector<8x32xf32>, vector<32x96xf32>, vector<8x96xf32> -> vector<8x96xf32>
    %56 = vector.broadcast %43 : vector<1x96xf32> to vector<8x96xf32>
    %57 = arith.addf %55, %56 : vector<8x96xf32>
    %58 = vector.extract_strided_slice %54 {offsets = [0, 0], sizes = [8, 32], strides = [1, 1]} : vector<8x96xf32> to vector<8x32xf32>
    %59 = vector.extract_strided_slice %57 {offsets = [0, 0], sizes = [8, 32], strides = [1, 1]} : vector<8x96xf32> to vector<8x32xf32>
    %60 = arith.addf %58, %59 : vector<8x32xf32>
    %61 = arith.negf %60 : vector<8x32xf32>
    %62 = math.exp %61 : vector<8x32xf32>
    %cst_40 = arith.constant 1.000000e+00 : f32
    %63 = vector.broadcast %cst_40 : f32 to vector<8x32xf32>
    %64 = arith.addf %63, %62 : vector<8x32xf32>
    %65 = arith.divf %63, %64 : vector<8x32xf32>
    %66 = vector.extract_strided_slice %54 {offsets = [0, 32], sizes = [8, 32], strides = [1, 1]} : vector<8x96xf32> to vector<8x32xf32>
    %67 = vector.extract_strided_slice %57 {offsets = [0, 32], sizes = [8, 32], strides = [1, 1]} : vector<8x96xf32> to vector<8x32xf32>
    %68 = arith.addf %66, %67 : vector<8x32xf32>
    %69 = arith.negf %68 : vector<8x32xf32>
    %70 = math.exp %69 : vector<8x32xf32>
    %cst_41 = arith.constant 1.000000e+00 : f32
    %71 = vector.broadcast %cst_41 : f32 to vector<8x32xf32>
    %72 = arith.addf %71, %70 : vector<8x32xf32>
    %73 = arith.divf %71, %72 : vector<8x32xf32>
    %74 = vector.extract_strided_slice %54 {offsets = [0, 64], sizes = [8, 32], strides = [1, 1]} : vector<8x96xf32> to vector<8x32xf32>
    %75 = vector.extract_strided_slice %57 {offsets = [0, 64], sizes = [8, 32], strides = [1, 1]} : vector<8x96xf32> to vector<8x32xf32>
    %76 = arith.mulf %65, %75 : vector<8x32xf32>
    %77 = arith.addf %74, %76 : vector<8x32xf32>
    %78 = math.tanh %77 : vector<8x32xf32>
    %cst_42 = arith.constant 1.000000e+00 : f32
    %79 = vector.broadcast %cst_42 : f32 to vector<8x32xf32>
    %80 = arith.subf %79, %73 : vector<8x32xf32>
    %81 = arith.mulf %80, %78 : vector<8x32xf32>
    %82 = arith.mulf %73, %48 : vector<8x32xf32>
    %83 = arith.addf %81, %82 : vector<8x32xf32>
    %cst_43 = arith.constant dense<0.000000e+00> : vector<8x96xf32>
    %84 = tpu.matmul %51, %44, %cst_43 {dimension_numbers = #tpu.dot_dimension_numbers<[1], [0], [0], [1], [0, 0, 1, 1], [], []>} : vector<8x32xf32>, vector<32x96xf32>, vector<8x96xf32> -> vector<8x96xf32>
    %85 = vector.broadcast %46 : vector<1x96xf32> to vector<8x96xf32>
    %86 = arith.addf %84, %85 : vector<8x96xf32>
    %cst_44 = arith.constant dense<0.000000e+00> : vector<8x96xf32>
    %87 = tpu.matmul %49, %45, %cst_44 {dimension_numbers = #tpu.dot_dimension_numbers<[1], [0], [0], [1], [0, 0, 1, 1], [], []>} : vector<8x32xf32>, vector<32x96xf32>, vector<8x96xf32> -> vector<8x96xf32>
    %88 = vector.broadcast %47 : vector<1x96xf32> to vector<8x96xf32>
    %89 = arith.addf %87, %88 : vector<8x96xf32>
    %90 = vector.extract_strided_slice %86 {offsets = [0, 0], sizes = [8, 32], strides = [1, 1]} : vector<8x96xf32> to vector<8x32xf32>
    %91 = vector.extract_strided_slice %89 {offsets = [0, 0], sizes = [8, 32], strides = [1, 1]} : vector<8x96xf32> to vector<8x32xf32>
    %92 = arith.addf %90, %91 : vector<8x32xf32>
    %93 = arith.negf %92 : vector<8x32xf32>
    %94 = math.exp %93 : vector<8x32xf32>
    %cst_45 = arith.constant 1.000000e+00 : f32
    %95 = vector.broadcast %cst_45 : f32 to vector<8x32xf32>
    %96 = arith.addf %95, %94 : vector<8x32xf32>
    %97 = arith.divf %95, %96 : vector<8x32xf32>
    %98 = vector.extract_strided_slice %86 {offsets = [0, 32], sizes = [8, 32], strides = [1, 1]} : vector<8x96xf32> to vector<8x32xf32>
    %99 = vector.extract_strided_slice %89 {offsets = [0, 32], sizes = [8, 32], strides = [1, 1]} : vector<8x96xf32> to vector<8x32xf32>
    %100 = arith.addf %98, %99 : vector<8x32xf32>
    %101 = arith.negf %100 : vector<8x32xf32>
    %102 = math.exp %101 : vector<8x32xf32>
    %cst_46 = arith.constant 1.000000e+00 : f32
    %103 = vector.broadcast %cst_46 : f32 to vector<8x32xf32>
    %104 = arith.addf %103, %102 : vector<8x32xf32>
    %105 = arith.divf %103, %104 : vector<8x32xf32>
    %106 = vector.extract_strided_slice %86 {offsets = [0, 64], sizes = [8, 32], strides = [1, 1]} : vector<8x96xf32> to vector<8x32xf32>
    %107 = vector.extract_strided_slice %89 {offsets = [0, 64], sizes = [8, 32], strides = [1, 1]} : vector<8x96xf32> to vector<8x32xf32>
    %108 = arith.mulf %97, %107 : vector<8x32xf32>
    %109 = arith.addf %106, %108 : vector<8x32xf32>
    %110 = math.tanh %109 : vector<8x32xf32>
    %cst_47 = arith.constant 1.000000e+00 : f32
    %111 = vector.broadcast %cst_47 : f32 to vector<8x32xf32>
    %112 = arith.subf %111, %105 : vector<8x32xf32>
    %113 = arith.mulf %112, %110 : vector<8x32xf32>
    %114 = arith.mulf %105, %49 : vector<8x32xf32>
    %115 = arith.addf %113, %114 : vector<8x32xf32>
    %116 = vector.extract_strided_slice %83 {offsets = [0, 0], sizes = [1, 32], strides = [1, 1]} : vector<8x32xf32> to vector<1x32xf32>
    %c0_48 = arith.constant 0 : index
    %c0_49 = arith.constant 0 : index
    %117 = vector.load %arg15[%c0_48, %c0_49] : memref<4x32xf32, #tpu.memory_space<vmem>>, vector<1x32xf32>
    tpu.vector_store %arg15[%c0_48, %c0_49], %116 {strides = array<i32>} : memref<4x32xf32, #tpu.memory_space<vmem>>, vector<1x32xf32>,
    %118 = vector.extract_strided_slice %115 {offsets = [0, 0], sizes = [1, 32], strides = [1, 1]} : vector<8x32xf32> to vector<1x32xf32>
    %c3 = arith.constant 3 : index
    %c0_50 = arith.constant 0 : index
    %119 = vector.load %arg16[%c3, %c0_50] : memref<4x32xf32, #tpu.memory_space<vmem>>, vector<1x32xf32>
    tpu.vector_store %arg16[%c3, %c0_50], %118 {strides = array<i32>} : memref<4x32xf32, #tpu.memory_space<vmem>>, vector<1x32xf32>,
    %120 = vector.extract_strided_slice %39 {offsets = [8, 0], sizes = [8, 32], strides = [1, 1]} : vector<32x32xf32> to vector<8x32xf32>
    %121 = vector.extract_strided_slice %39 {offsets = [16, 0], sizes = [8, 32], strides = [1, 1]} : vector<32x32xf32> to vector<8x32xf32>
    %cst_51 = arith.constant dense<0.000000e+00> : vector<8x96xf32>
    %122 = tpu.matmul %120, %40, %cst_51 {dimension_numbers = #tpu.dot_dimension_numbers<[1], [0], [0], [1], [0, 0, 1, 1], [], []>} : vector<8x32xf32>, vector<32x96xf32>, vector<8x96xf32> -> vector<8x96xf32>
    %123 = vector.broadcast %42 : vector<1x96xf32> to vector<8x96xf32>
    %124 = arith.addf %122, %123 : vector<8x96xf32>
    %cst_52 = arith.constant dense<0.000000e+00> : vector<8x96xf32>
    %125 = tpu.matmul %83, %41, %cst_52 {dimension_numbers = #tpu.dot_dimension_numbers<[1], [0], [0], [1], [0, 0, 1, 1], [], []>} : vector<8x32xf32>, vector<32x96xf32>, vector<8x96xf32> -> vector<8x96xf32>
    %126 = vector.broadcast %43 : vector<1x96xf32> to vector<8x96xf32>
    %127 = arith.addf %125, %126 : vector<8x96xf32>
    %128 = vector.extract_strided_slice %124 {offsets = [0, 0], sizes = [8, 32], strides = [1, 1]} : vector<8x96xf32> to vector<8x32xf32>
    %129 = vector.extract_strided_slice %127 {offsets = [0, 0], sizes = [8, 32], strides = [1, 1]} : vector<8x96xf32> to vector<8x32xf32>
    %130 = arith.addf %128, %129 : vector<8x32xf32>
    %131 = arith.negf %130 : vector<8x32xf32>
    %132 = math.exp %131 : vector<8x32xf32>
    %cst_53 = arith.constant 1.000000e+00 : f32
    %133 = vector.broadcast %cst_53 : f32 to vector<8x32xf32>
    %134 = arith.addf %133, %132 : vector<8x32xf32>
    %135 = arith.divf %133, %134 : vector<8x32xf32>
    %136 = vector.extract_strided_slice %124 {offsets = [0, 32], sizes = [8, 32], strides = [1, 1]} : vector<8x96xf32> to vector<8x32xf32>
    %137 = vector.extract_strided_slice %127 {offsets = [0, 32], sizes = [8, 32], strides = [1, 1]} : vector<8x96xf32> to vector<8x32xf32>
    %138 = arith.addf %136, %137 : vector<8x32xf32>
    %139 = arith.negf %138 : vector<8x32xf32>
    %140 = math.exp %139 : vector<8x32xf32>
    %cst_54 = arith.constant 1.000000e+00 : f32
    %141 = vector.broadcast %cst_54 : f32 to vector<8x32xf32>
    %142 = arith.addf %141, %140 : vector<8x32xf32>
    %143 = arith.divf %141, %142 : vector<8x32xf32>
    %144 = vector.extract_strided_slice %124 {offsets = [0, 64], sizes = [8, 32], strides = [1, 1]} : vector<8x96xf32> to vector<8x32xf32>
    %145 = vector.extract_strided_slice %127 {offsets = [0, 64], sizes = [8, 32], strides = [1, 1]} : vector<8x96xf32> to vector<8x32xf32>
    %146 = arith.mulf %135, %145 : vector<8x32xf32>
    %147 = arith.addf %144, %146 : vector<8x32xf32>
    %148 = math.tanh %147 : vector<8x32xf32>
    %cst_55 = arith.constant 1.000000e+00 : f32
    %149 = vector.broadcast %cst_55 : f32 to vector<8x32xf32>
    %150 = arith.subf %149, %143 : vector<8x32xf32>
    %151 = arith.mulf %150, %148 : vector<8x32xf32>
    %152 = arith.mulf %143, %83 : vector<8x32xf32>
    %153 = arith.addf %151, %152 : vector<8x32xf32>
    %cst_56 = arith.constant dense<0.000000e+00> : vector<8x96xf32>
    %154 = tpu.matmul %121, %44, %cst_56 {dimension_numbers = #tpu.dot_dimension_numbers<[1], [0], [0], [1], [0, 0, 1, 1], [], []>} : vector<8x32xf32>, vector<32x96xf32>, vector<8x96xf32> -> vector<8x96xf32>
    %155 = vector.broadcast %46 : vector<1x96xf32> to vector<8x96xf32>
    %156 = arith.addf %154, %155 : vector<8x96xf32>
    %cst_57 = arith.constant dense<0.000000e+00> : vector<8x96xf32>
    %157 = tpu.matmul %115, %45, %cst_57 {dimension_numbers = #tpu.dot_dimension_numbers<[1], [0], [0], [1], [0, 0, 1, 1], [], []>} : vector<8x32xf32>, vector<32x96xf32>, vector<8x96xf32> -> vector<8x96xf32>
    %158 = vector.broadcast %47 : vector<1x96xf32> to vector<8x96xf32>
    %159 = arith.addf %157, %158 : vector<8x96xf32>
    %160 = vector.extract_strided_slice %156 {offsets = [0, 0], sizes = [8, 32], strides = [1, 1]} : vector<8x96xf32> to vector<8x32xf32>
    %161 = vector.extract_strided_slice %159 {offsets = [0, 0], sizes = [8, 32], strides = [1, 1]} : vector<8x96xf32> to vector<8x32xf32>
    %162 = arith.addf %160, %161 : vector<8x32xf32>
    %163 = arith.negf %162 : vector<8x32xf32>
    %164 = math.exp %163 : vector<8x32xf32>
    %cst_58 = arith.constant 1.000000e+00 : f32
    %165 = vector.broadcast %cst_58 : f32 to vector<8x32xf32>
    %166 = arith.addf %165, %164 : vector<8x32xf32>
    %167 = arith.divf %165, %166 : vector<8x32xf32>
    %168 = vector.extract_strided_slice %156 {offsets = [0, 32], sizes = [8, 32], strides = [1, 1]} : vector<8x96xf32> to vector<8x32xf32>
    %169 = vector.extract_strided_slice %159 {offsets = [0, 32], sizes = [8, 32], strides = [1, 1]} : vector<8x96xf32> to vector<8x32xf32>
    %170 = arith.addf %168, %169 : vector<8x32xf32>
    %171 = arith.negf %170 : vector<8x32xf32>
    %172 = math.exp %171 : vector<8x32xf32>
    %cst_59 = arith.constant 1.000000e+00 : f32
    %173 = vector.broadcast %cst_59 : f32 to vector<8x32xf32>
    %174 = arith.addf %173, %172 : vector<8x32xf32>
    %175 = arith.divf %173, %174 : vector<8x32xf32>
    %176 = vector.extract_strided_slice %156 {offsets = [0, 64], sizes = [8, 32], strides = [1, 1]} : vector<8x96xf32> to vector<8x32xf32>
    %177 = vector.extract_strided_slice %159 {offsets = [0, 64], sizes = [8, 32], strides = [1, 1]} : vector<8x96xf32> to vector<8x32xf32>
    %178 = arith.mulf %167, %177 : vector<8x32xf32>
    %179 = arith.addf %176, %178 : vector<8x32xf32>
    %180 = math.tanh %179 : vector<8x32xf32>
    %cst_60 = arith.constant 1.000000e+00 : f32
    %181 = vector.broadcast %cst_60 : f32 to vector<8x32xf32>
    %182 = arith.subf %181, %175 : vector<8x32xf32>
    %183 = arith.mulf %182, %180 : vector<8x32xf32>
    %184 = arith.mulf %175, %115 : vector<8x32xf32>
    %185 = arith.addf %183, %184 : vector<8x32xf32>
    %186 = vector.extract_strided_slice %153 {offsets = [0, 0], sizes = [1, 32], strides = [1, 1]} : vector<8x32xf32> to vector<1x32xf32>
    %c1 = arith.constant 1 : index
    %c0_61 = arith.constant 0 : index
    %187 = vector.load %arg15[%c1, %c0_61] : memref<4x32xf32, #tpu.memory_space<vmem>>, vector<1x32xf32>
    tpu.vector_store %arg15[%c1, %c0_61], %186 {strides = array<i32>} : memref<4x32xf32, #tpu.memory_space<vmem>>, vector<1x32xf32>,
    %188 = vector.extract_strided_slice %185 {offsets = [0, 0], sizes = [1, 32], strides = [1, 1]} : vector<8x32xf32> to vector<1x32xf32>
    %c2 = arith.constant 2 : index
    %c0_62 = arith.constant 0 : index
    %189 = vector.load %arg16[%c2, %c0_62] : memref<4x32xf32, #tpu.memory_space<vmem>>, vector<1x32xf32>
    tpu.vector_store %arg16[%c2, %c0_62], %188 {strides = array<i32>} : memref<4x32xf32, #tpu.memory_space<vmem>>, vector<1x32xf32>,
    %190 = vector.extract_strided_slice %39 {offsets = [16, 0], sizes = [8, 32], strides = [1, 1]} : vector<32x32xf32> to vector<8x32xf32>
    %191 = vector.extract_strided_slice %39 {offsets = [8, 0], sizes = [8, 32], strides = [1, 1]} : vector<32x32xf32> to vector<8x32xf32>
    %cst_63 = arith.constant dense<0.000000e+00> : vector<8x96xf32>
    %192 = tpu.matmul %190, %40, %cst_63 {dimension_numbers = #tpu.dot_dimension_numbers<[1], [0], [0], [1], [0, 0, 1, 1], [], []>} : vector<8x32xf32>, vector<32x96xf32>, vector<8x96xf32> -> vector<8x96xf32>
    %193 = vector.broadcast %42 : vector<1x96xf32> to vector<8x96xf32>
    %194 = arith.addf %192, %193 : vector<8x96xf32>
    %cst_64 = arith.constant dense<0.000000e+00> : vector<8x96xf32>
    %195 = tpu.matmul %153, %41, %cst_64 {dimension_numbers = #tpu.dot_dimension_numbers<[1], [0], [0], [1], [0, 0, 1, 1], [], []>} : vector<8x32xf32>, vector<32x96xf32>, vector<8x96xf32> -> vector<8x96xf32>
    %196 = vector.broadcast %43 : vector<1x96xf32> to vector<8x96xf32>
    %197 = arith.addf %195, %196 : vector<8x96xf32>
    %198 = vector.extract_strided_slice %194 {offsets = [0, 0], sizes = [8, 32], strides = [1, 1]} : vector<8x96xf32> to vector<8x32xf32>
    %199 = vector.extract_strided_slice %197 {offsets = [0, 0], sizes = [8, 32], strides = [1, 1]} : vector<8x96xf32> to vector<8x32xf32>
    %200 = arith.addf %198, %199 : vector<8x32xf32>
    %201 = arith.negf %200 : vector<8x32xf32>
    %202 = math.exp %201 : vector<8x32xf32>
    %cst_65 = arith.constant 1.000000e+00 : f32
    %203 = vector.broadcast %cst_65 : f32 to vector<8x32xf32>
    %204 = arith.addf %203, %202 : vector<8x32xf32>
    %205 = arith.divf %203, %204 : vector<8x32xf32>
    %206 = vector.extract_strided_slice %194 {offsets = [0, 32], sizes = [8, 32], strides = [1, 1]} : vector<8x96xf32> to vector<8x32xf32>
    %207 = vector.extract_strided_slice %197 {offsets = [0, 32], sizes = [8, 32], strides = [1, 1]} : vector<8x96xf32> to vector<8x32xf32>
    %208 = arith.addf %206, %207 : vector<8x32xf32>
    %209 = arith.negf %208 : vector<8x32xf32>
    %210 = math.exp %209 : vector<8x32xf32>
    %cst_66 = arith.constant 1.000000e+00 : f32
    %211 = vector.broadcast %cst_66 : f32 to vector<8x32xf32>
    %212 = arith.addf %211, %210 : vector<8x32xf32>
    %213 = arith.divf %211, %212 : vector<8x32xf32>
    %214 = vector.extract_strided_slice %194 {offsets = [0, 64], sizes = [8, 32], strides = [1, 1]} : vector<8x96xf32> to vector<8x32xf32>
    %215 = vector.extract_strided_slice %197 {offsets = [0, 64], sizes = [8, 32], strides = [1, 1]} : vector<8x96xf32> to vector<8x32xf32>
    %216 = arith.mulf %205, %215 : vector<8x32xf32>
    %217 = arith.addf %214, %216 : vector<8x32xf32>
    %218 = math.tanh %217 : vector<8x32xf32>
    %cst_67 = arith.constant 1.000000e+00 : f32
    %219 = vector.broadcast %cst_67 : f32 to vector<8x32xf32>
    %220 = arith.subf %219, %213 : vector<8x32xf32>
    %221 = arith.mulf %220, %218 : vector<8x32xf32>
    %222 = arith.mulf %213, %153 : vector<8x32xf32>
    %223 = arith.addf %221, %222 : vector<8x32xf32>
    %cst_68 = arith.constant dense<0.000000e+00> : vector<8x96xf32>
    %224 = tpu.matmul %191, %44, %cst_68 {dimension_numbers = #tpu.dot_dimension_numbers<[1], [0], [0], [1], [0, 0, 1, 1], [], []>} : vector<8x32xf32>, vector<32x96xf32>, vector<8x96xf32> -> vector<8x96xf32>
    %225 = vector.broadcast %46 : vector<1x96xf32> to vector<8x96xf32>
    %226 = arith.addf %224, %225 : vector<8x96xf32>
    %cst_69 = arith.constant dense<0.000000e+00> : vector<8x96xf32>
    %227 = tpu.matmul %185, %45, %cst_69 {dimension_numbers = #tpu.dot_dimension_numbers<[1], [0], [0], [1], [0, 0, 1, 1], [], []>} : vector<8x32xf32>, vector<32x96xf32>, vector<8x96xf32> -> vector<8x96xf32>
    %228 = vector.broadcast %47 : vector<1x96xf32> to vector<8x96xf32>
    %229 = arith.addf %227, %228 : vector<8x96xf32>
    %230 = vector.extract_strided_slice %226 {offsets = [0, 0], sizes = [8, 32], strides = [1, 1]} : vector<8x96xf32> to vector<8x32xf32>
    %231 = vector.extract_strided_slice %229 {offsets = [0, 0], sizes = [8, 32], strides = [1, 1]} : vector<8x96xf32> to vector<8x32xf32>
    %232 = arith.addf %230, %231 : vector<8x32xf32>
    %233 = arith.negf %232 : vector<8x32xf32>
    %234 = math.exp %233 : vector<8x32xf32>
    %cst_70 = arith.constant 1.000000e+00 : f32
    %235 = vector.broadcast %cst_70 : f32 to vector<8x32xf32>
    %236 = arith.addf %235, %234 : vector<8x32xf32>
    %237 = arith.divf %235, %236 : vector<8x32xf32>
    %238 = vector.extract_strided_slice %226 {offsets = [0, 32], sizes = [8, 32], strides = [1, 1]} : vector<8x96xf32> to vector<8x32xf32>
    %239 = vector.extract_strided_slice %229 {offsets = [0, 32], sizes = [8, 32], strides = [1, 1]} : vector<8x96xf32> to vector<8x32xf32>
    %240 = arith.addf %238, %239 : vector<8x32xf32>
    %241 = arith.negf %240 : vector<8x32xf32>
    %242 = math.exp %241 : vector<8x32xf32>
    %cst_71 = arith.constant 1.000000e+00 : f32
    %243 = vector.broadcast %cst_71 : f32 to vector<8x32xf32>
    %244 = arith.addf %243, %242 : vector<8x32xf32>
    %245 = arith.divf %243, %244 : vector<8x32xf32>
    %246 = vector.extract_strided_slice %226 {offsets = [0, 64], sizes = [8, 32], strides = [1, 1]} : vector<8x96xf32> to vector<8x32xf32>
    %247 = vector.extract_strided_slice %229 {offsets = [0, 64], sizes = [8, 32], strides = [1, 1]} : vector<8x96xf32> to vector<8x32xf32>
    %248 = arith.mulf %237, %247 : vector<8x32xf32>
    %249 = arith.addf %246, %248 : vector<8x32xf32>
    %250 = math.tanh %249 : vector<8x32xf32>
    %cst_72 = arith.constant 1.000000e+00 : f32
    %251 = vector.broadcast %cst_72 : f32 to vector<8x32xf32>
    %252 = arith.subf %251, %245 : vector<8x32xf32>
    %253 = arith.mulf %252, %250 : vector<8x32xf32>
    %254 = arith.mulf %245, %185 : vector<8x32xf32>
    %255 = arith.addf %253, %254 : vector<8x32xf32>
    %256 = vector.extract_strided_slice %223 {offsets = [0, 0], sizes = [1, 32], strides = [1, 1]} : vector<8x32xf32> to vector<1x32xf32>
    %c2_73 = arith.constant 2 : index
    %c0_74 = arith.constant 0 : index
    %257 = vector.load %arg15[%c2_73, %c0_74] : memref<4x32xf32, #tpu.memory_space<vmem>>, vector<1x32xf32>
    tpu.vector_store %arg15[%c2_73, %c0_74], %256 {strides = array<i32>} : memref<4x32xf32, #tpu.memory_space<vmem>>, vector<1x32xf32>,
    %258 = vector.extract_strided_slice %255 {offsets = [0, 0], sizes = [1, 32], strides = [1, 1]} : vector<8x32xf32> to vector<1x32xf32>
    %c1_75 = arith.constant 1 : index
    %c0_76 = arith.constant 0 : index
    %259 = vector.load %arg16[%c1_75, %c0_76] : memref<4x32xf32, #tpu.memory_space<vmem>>, vector<1x32xf32>
    tpu.vector_store %arg16[%c1_75, %c0_76], %258 {strides = array<i32>} : memref<4x32xf32, #tpu.memory_space<vmem>>, vector<1x32xf32>,
    %260 = vector.extract_strided_slice %39 {offsets = [24, 0], sizes = [8, 32], strides = [1, 1]} : vector<32x32xf32> to vector<8x32xf32>
    %261 = vector.extract_strided_slice %39 {offsets = [0, 0], sizes = [8, 32], strides = [1, 1]} : vector<32x32xf32> to vector<8x32xf32>
    %cst_77 = arith.constant dense<0.000000e+00> : vector<8x96xf32>
    %262 = tpu.matmul %260, %40, %cst_77 {dimension_numbers = #tpu.dot_dimension_numbers<[1], [0], [0], [1], [0, 0, 1, 1], [], []>} : vector<8x32xf32>, vector<32x96xf32>, vector<8x96xf32> -> vector<8x96xf32>
    %263 = vector.broadcast %42 : vector<1x96xf32> to vector<8x96xf32>
    %264 = arith.addf %262, %263 : vector<8x96xf32>
    %cst_78 = arith.constant dense<0.000000e+00> : vector<8x96xf32>
    %265 = tpu.matmul %223, %41, %cst_78 {dimension_numbers = #tpu.dot_dimension_numbers<[1], [0], [0], [1], [0, 0, 1, 1], [], []>} : vector<8x32xf32>, vector<32x96xf32>, vector<8x96xf32> -> vector<8x96xf32>
    %266 = vector.broadcast %43 : vector<1x96xf32> to vector<8x96xf32>
    %267 = arith.addf %265, %266 : vector<8x96xf32>
    %268 = vector.extract_strided_slice %264 {offsets = [0, 0], sizes = [8, 32], strides = [1, 1]} : vector<8x96xf32> to vector<8x32xf32>
    %269 = vector.extract_strided_slice %267 {offsets = [0, 0], sizes = [8, 32], strides = [1, 1]} : vector<8x96xf32> to vector<8x32xf32>
    %270 = arith.addf %268, %269 : vector<8x32xf32>
    %271 = arith.negf %270 : vector<8x32xf32>
    %272 = math.exp %271 : vector<8x32xf32>
    %cst_79 = arith.constant 1.000000e+00 : f32
    %273 = vector.broadcast %cst_79 : f32 to vector<8x32xf32>
    %274 = arith.addf %273, %272 : vector<8x32xf32>
    %275 = arith.divf %273, %274 : vector<8x32xf32>
    %276 = vector.extract_strided_slice %264 {offsets = [0, 32], sizes = [8, 32], strides = [1, 1]} : vector<8x96xf32> to vector<8x32xf32>
    %277 = vector.extract_strided_slice %267 {offsets = [0, 32], sizes = [8, 32], strides = [1, 1]} : vector<8x96xf32> to vector<8x32xf32>
    %278 = arith.addf %276, %277 : vector<8x32xf32>
    %279 = arith.negf %278 : vector<8x32xf32>
    %280 = math.exp %279 : vector<8x32xf32>
    %cst_80 = arith.constant 1.000000e+00 : f32
    %281 = vector.broadcast %cst_80 : f32 to vector<8x32xf32>
    %282 = arith.addf %281, %280 : vector<8x32xf32>
    %283 = arith.divf %281, %282 : vector<8x32xf32>
    %284 = vector.extract_strided_slice %264 {offsets = [0, 64], sizes = [8, 32], strides = [1, 1]} : vector<8x96xf32> to vector<8x32xf32>
    %285 = vector.extract_strided_slice %267 {offsets = [0, 64], sizes = [8, 32], strides = [1, 1]} : vector<8x96xf32> to vector<8x32xf32>
    %286 = arith.mulf %275, %285 : vector<8x32xf32>
    %287 = arith.addf %284, %286 : vector<8x32xf32>
    %288 = math.tanh %287 : vector<8x32xf32>
    %cst_81 = arith.constant 1.000000e+00 : f32
    %289 = vector.broadcast %cst_81 : f32 to vector<8x32xf32>
    %290 = arith.subf %289, %283 : vector<8x32xf32>
    %291 = arith.mulf %290, %288 : vector<8x32xf32>
    %292 = arith.mulf %283, %223 : vector<8x32xf32>
    %293 = arith.addf %291, %292 : vector<8x32xf32>
    %cst_82 = arith.constant dense<0.000000e+00> : vector<8x96xf32>
    %294 = tpu.matmul %261, %44, %cst_82 {dimension_numbers = #tpu.dot_dimension_numbers<[1], [0], [0], [1], [0, 0, 1, 1], [], []>} : vector<8x32xf32>, vector<32x96xf32>, vector<8x96xf32> -> vector<8x96xf32>
    %295 = vector.broadcast %46 : vector<1x96xf32> to vector<8x96xf32>
    %296 = arith.addf %294, %295 : vector<8x96xf32>
    %cst_83 = arith.constant dense<0.000000e+00> : vector<8x96xf32>
    %297 = tpu.matmul %255, %45, %cst_83 {dimension_numbers = #tpu.dot_dimension_numbers<[1], [0], [0], [1], [0, 0, 1, 1], [], []>} : vector<8x32xf32>, vector<32x96xf32>, vector<8x96xf32> -> vector<8x96xf32>
    %298 = vector.broadcast %47 : vector<1x96xf32> to vector<8x96xf32>
    %299 = arith.addf %297, %298 : vector<8x96xf32>
    %300 = vector.extract_strided_slice %296 {offsets = [0, 0], sizes = [8, 32], strides = [1, 1]} : vector<8x96xf32> to vector<8x32xf32>
    %301 = vector.extract_strided_slice %299 {offsets = [0, 0], sizes = [8, 32], strides = [1, 1]} : vector<8x96xf32> to vector<8x32xf32>
    %302 = arith.addf %300, %301 : vector<8x32xf32>
    %303 = arith.negf %302 : vector<8x32xf32>
    %304 = math.exp %303 : vector<8x32xf32>
    %cst_84 = arith.constant 1.000000e+00 : f32
    %305 = vector.broadcast %cst_84 : f32 to vector<8x32xf32>
    %306 = arith.addf %305, %304 : vector<8x32xf32>
    %307 = arith.divf %305, %306 : vector<8x32xf32>
    %308 = vector.extract_strided_slice %296 {offsets = [0, 32], sizes = [8, 32], strides = [1, 1]} : vector<8x96xf32> to vector<8x32xf32>
    %309 = vector.extract_strided_slice %299 {offsets = [0, 32], sizes = [8, 32], strides = [1, 1]} : vector<8x96xf32> to vector<8x32xf32>
    %310 = arith.addf %308, %309 : vector<8x32xf32>
    %311 = arith.negf %310 : vector<8x32xf32>
    %312 = math.exp %311 : vector<8x32xf32>
    %cst_85 = arith.constant 1.000000e+00 : f32
    %313 = vector.broadcast %cst_85 : f32 to vector<8x32xf32>
    %314 = arith.addf %313, %312 : vector<8x32xf32>
    %315 = arith.divf %313, %314 : vector<8x32xf32>
    %316 = vector.extract_strided_slice %296 {offsets = [0, 64], sizes = [8, 32], strides = [1, 1]} : vector<8x96xf32> to vector<8x32xf32>
    %317 = vector.extract_strided_slice %299 {offsets = [0, 64], sizes = [8, 32], strides = [1, 1]} : vector<8x96xf32> to vector<8x32xf32>
    %318 = arith.mulf %307, %317 : vector<8x32xf32>
    %319 = arith.addf %316, %318 : vector<8x32xf32>
    %320 = math.tanh %319 : vector<8x32xf32>
    %cst_86 = arith.constant 1.000000e+00 : f32
    %321 = vector.broadcast %cst_86 : f32 to vector<8x32xf32>
    %322 = arith.subf %321, %315 : vector<8x32xf32>
    %323 = arith.mulf %322, %320 : vector<8x32xf32>
    %324 = arith.mulf %315, %255 : vector<8x32xf32>
    %325 = arith.addf %323, %324 : vector<8x32xf32>
    %326 = vector.extract_strided_slice %293 {offsets = [0, 0], sizes = [1, 32], strides = [1, 1]} : vector<8x32xf32> to vector<1x32xf32>
    %c3_87 = arith.constant 3 : index
    %c0_88 = arith.constant 0 : index
    %327 = vector.load %arg15[%c3_87, %c0_88] : memref<4x32xf32, #tpu.memory_space<vmem>>, vector<1x32xf32>
    tpu.vector_store %arg15[%c3_87, %c0_88], %326 {strides = array<i32>} : memref<4x32xf32, #tpu.memory_space<vmem>>, vector<1x32xf32>,
    %328 = vector.extract_strided_slice %325 {offsets = [0, 0], sizes = [1, 32], strides = [1, 1]} : vector<8x32xf32> to vector<1x32xf32>
    %c0_89 = arith.constant 0 : index
    %c0_90 = arith.constant 0 : index
    %329 = vector.load %arg16[%c0_89, %c0_90] : memref<4x32xf32, #tpu.memory_space<vmem>>, vector<1x32xf32>
    tpu.vector_store %arg16[%c0_89, %c0_90], %328 {strides = array<i32>} : memref<4x32xf32, #tpu.memory_space<vmem>>, vector<1x32xf32>,
    return
  }
}

</mosaic_0001>

<bundles_post_ra>
// kernel: generator_forward.3
= control target key start
LH: loop header
LB: loop body
LE: loop exit
PB: predicated region body
PF: predicated region fallthrough
CT: control target
= control target key end

     0   :  { %s1101_s0 = inlined_call_operand.vmem [shape: f32[4,32], index: 0, kind: input, shape index: {}]   ;;  %s1102_s1 = inlined_call_operand.vmem [shape: f32[4,32], index: 1, kind: input, shape index: {}]   ;;  %s1103_s2 = inlined_call_operand.hbm [shape: f32[4,8], index: 2, kind: input, shape index: {}]   ;;  %s1104_s3 = inlined_call_operand.vmem [shape: f32[32,32], index: 3, kind: input, shape index: {}]   ;;  %s1105_s4 = inlined_call_operand.vmem [shape: f32[32,32], index: 4, kind: input, shape index: {}]   ;;  %s1106_s5 = inlined_call_operand.vmem [shape: f32[1,32], index: 5, kind: input, shape index: {}]   ;;  %s1107_s6 = inlined_call_operand.vmem [shape: f32[1,32], index: 6, kind: input, shape index: {}]   ;;  %s1108_s7 = inlined_call_operand.vmem [shape: f32[1,32], index: 7, kind: input, shape index: {}]   ;;  %s1109_s8 = inlined_call_operand.vmem [shape: f32[32,32], index: 8, kind: input, shape index: {}]   ;;  %s1110_s9 = inlined_call_operand.vmem [shape: f32[1,32], index: 9, kind: input, shape index: {}]   ;;  %s1111_s10 = inlined_call_operand.hbm [shape: f32[32,64], index: 10, kind: input, shape index: {}]   ;;  %s1112_s11 = inlined_call_operand.vmem [shape: f32[1,64], index: 11, kind: input, shape index: {}]   ;;  %s1113_s12 = inlined_call_operand.vmem [shape: f32[1,64], index: 12, kind: input, shape index: {}]   ;;  %s1114_s13 = inlined_call_operand.vmem [shape: f32[1,64], index: 13, kind: input, shape index: {}]   ;;  %s1115_s14 = inlined_call_operand.vmem [shape: f32[32,8], index: 14, kind: input, shape index: {}]   ;;  %s1116_s15 = inlined_call_operand.vmem [shape: f32[1,8], index: 15, kind: input, shape index: {}]   ;;  %s1117_s16 = inlined_call_operand.vmem [shape: f32[32,8], index: 16, kind: input, shape index: {}]   ;;  %s1118_s17 = inlined_call_operand.vmem [shape: f32[1,8], index: 17, kind: input, shape index: {}]   ;;  %s1119_s18 = inlined_call_operand.vmem [shape: f32[8,32], index: 18, kind: input, shape index: {}]   ;;  %s1120_s19 = inlined_call_operand.vmem [shape: f32[1,32], index: 19, kind: input, shape index: {}]   ;;  %s1121_s20 = inlined_call_operand.vmem [shape: f32[1,32], index: 20, kind: input, shape index: {}]   ;;  %s1122_s21 = inlined_call_operand.vmem [shape: f32[1,32], index: 21, kind: input, shape index: {}]   ;;  %s1123_s22 = inlined_call_operand.vmem [shape: f32[32,8], index: 22, kind: input, shape index: {}]   ;;  %s1124_s23 = inlined_call_operand.vmem [shape: f32[1,8], index: 23, kind: input, shape index: {}]   ;;  %s1125_s24 = inlined_call_operand.hbm [shape: f32[4,8], index: 24, kind: output, shape index: {0}]   ;;  %s1126_s25 = inlined_call_operand.hbm [shape: f32[4,8], index: 25, kind: output, shape index: {1}]   ;;  %s1127_s26 = inlined_call_operand.hbm [shape: f32[4,8], index: 26, kind: output, shape index: {2}]  }
   0x1   :  { %1131 = sst [smem:[#allocation15_spill]] %s1101_s0 }
   0x2   :  { %1132 = sst [smem:[#allocation16_spill]] %s1102_s1 }
   0x3   :  { %1133 = sst [smem:[#allocation17_spill]] %s1103_s2 }
   0x4   :  { %1134 = sst [smem:[#allocation18_spill]] %s1104_s3 }
   0x5   :  { %1135 = sst [smem:[#allocation19_spill]] %s1105_s4 }
   0x6   :  { %1136 = sst [smem:[#allocation20_spill]] %s1106_s5 }
   0x7   :  { %1137 = sst [smem:[#allocation21_spill]] %s1107_s6 }
   0x8   :  { %1138 = sst [smem:[#allocation22_spill]] %s1108_s7 }
   0x9   :  { %1139 = sst [smem:[#allocation23_spill]] %s1109_s8 }
   0xa   :  { %1140 = sst [smem:[#allocation24_spill]] %s1110_s9 }
   0xb   :  { %1141 = sst [smem:[#allocation25_spill]] %s1111_s10 }
   0xc   :  { %32 = vsyncpa [#allocation3], 0 }
   0xd   :  { %33 = vsyncpa [#allocation6], 0 }
   0xe   :  { %34 = vsyncpa [#allocation4], 0 }
   0xf   :  { %35 = vsyncpa [#allocation9], 0  ;;  %s1142_s7 = sld [smem:[#allocation17_spill]]  ;;  %s800_s8 = smov [#allocation2]  }
  0x10   :  { %s47_s4 = sshll.u32 %s800_s8, 4  ;;  %s1143_s9 = sld [smem:[#allocation25_spill]]  ;;  %s48_s4 = int_to_ptr.vmem [resolvable:$true] %s47_s4 }
  0x11   :  { %s801_s2 = smov [#allocation5]   ;;  %s802_s10 = smov 128  }
  0x12   :  { %s71_s5 = sshll.u32 %s801_s2, 4  ;;  %s803_s6 = smov 8   ;;  %s72_s5 = int_to_ptr.vmem [resolvable:$true] %s71_s5 }
  0x15   :  { %s45_s28 = sshll.u32 %s1142_s7, 4  ;;  %s46_s28 = int_to_ptr.hbm [resolvable:$true] %s45_s28 }
  0x16   :  { %s69_s30 = sshll.u32 %s1143_s9, 4  ;;  %s70_s30 = int_to_ptr.hbm [resolvable:$true] %s69_s30 }
  0x17   :  { %50 = dma.hbm_to_vmem [thread:$0]  %s46_s28, 64, %s48_s4, [#allocation3]  }
  0x18   :  { %77 = dma.hbm_to_vmem [thread:$0]  %s70_s30, 512, %s72_s5, [#allocation6], %s802_s10, %s802_s10, %s803_s6  }
  0x19   :  { %792 = dma.done.wait [#allocation3], 64  }
  0x1a   :  { %793 = vsyncadd [#allocation3], 4294967232 }
  0x1b   :  { %794 = dma.done.wait [#allocation6], 512  }
  0x1c   :  { %795 = vsyncadd [#allocation6], 4294966784  ;;  %s1144_s3 = sld [smem:[#allocation19_spill]]  ;;  %vm122_vm0 = vcmask 261120   ;;  %v804_v22 = vmov 4.0   ;;  %vm193_vm4 = vcmask 257024  }
  0x1d   :  { %s1145_s29 = sld [smem:[#allocation18_spill]]  ;;  %v275_v55 = vld [vmem:[#allocation5 + $0x18] sm:$0xff]  ;;  %v274_v56 = vld [vmem:[#allocation5 + $0x10] sm:$0xff]  ;;  %vm322_vm13 = vcmask 519168   ;;  %s805_s28 = smov 96  }
  0x1e   :  { %s1146_s4 = sld [smem:[#allocation16_spill]]  ;;  %295 = vmatpush.msra.mxu3 %v275_v55  ;;  %v394_v55 = vld [vmem:[%s1117_s16] sm:$0xff]  ;;  %s806_s27 = smov [#allocation8]  }
  0x1f   :  { %s1147_s30 = sld [smem:[#allocation15_spill]]  ;;  %s582_s7 = sshll.u32 %s806_s27, 4  ;;  %s583_s7 = int_to_ptr.vmem [resolvable:$true] %s582_s7 }
  0x20   :  { %s1148_s2 = sld [smem:[#allocation23_spill]]  ;;  %296 = vmatpush.msra.mxu3 %v274_v56 }
  0x21   :  { %s1152_s6 = sld [smem:[#allocation24_spill]] }
  0x22   :  { %v121_v0 = vld [vmem:[%s1144_s3 + $0x18] sm:$0xff]  ;;  %v120_v2 = vld [vmem:[%s1144_s3 + $0x10] sm:$0xff]  ;;  %v119_v4 = vld [vmem:[%s1144_s3 + $0x8] sm:$0xff] }
  0x23   :  { %v116_v1 = vld [vmem:[%s1145_s29 + $0x18] sm:$0xff]  ;;  %138 = vmatpush.msra.mxu0 %v121_v0  ;;  %v115_v3 = vld [vmem:[%s1145_s29 + $0x10] sm:$0xff]  ;;  %v114_v5 = vld [vmem:[%s1145_s29 + $0x8] sm:$0xff] }
  0x24   :  { %161 = vmatpush.msra.mxu1 %v116_v1  ;;  %v118_v6 = vld [vmem:[%s1144_s3] sm:$0xff] }
  0x25   :  { %v113_v7 = vld [vmem:[%s1145_s29] sm:$0xff]  ;;  %139 = vmatpush.msra.mxu0 %v120_v2 }
  0x26   :  { %162 = vmatpush.msra.mxu1 %v115_v3  ;;  %v117_v8 = vld [vmem:[%s1146_s4] sm:$0xf]  ;;  %v244_v10 = vld [vmem:[%s1148_s2 + $0x18] sm:$0xff]  ;;  %v243_v11 = vld [vmem:[%s1148_s2 + $0x10] sm:$0xff]  ;;  %s1149_s4 = sld [smem:[#allocation20_spill]] }
  0x27   :  { %v112_v9 = vld [vmem:[%s1147_s30] sm:$0xf]  ;;  %140 = vmatpush.msra.mxu0 %v119_v4  ;;  %264 = vmatpush.msra.mxu2 %v244_v10  ;;  %v242_v12 = vld [vmem:[%s1148_s2 + $0x8] sm:$0xff]  ;;  %s1150_s30 = sld [smem:[#allocation21_spill]] }
  0x28   :  { %163 = vmatpush.msra.mxu1 %v114_v5  ;;  %v241_v13 = vld [vmem:[%s1148_s2] sm:$0xff]  ;;  %s1151_s2 = sld [smem:[#allocation22_spill]] }
  0x29   :  { %141 = vmatpush.msra.mxu0 %v118_v6  ;;  %265 = vmatpush.msra.mxu2 %v243_v11  ;;  %v638_v10 = vld [vmem:[%s1152_s6] ss:$0 sm:$0xff] }
  0x2a   :  { %164 = vmatpush.msra.mxu1 %v113_v7  ;;  %615 = vmatmul.msk.f32.vlgmr.msra.gmra.mxu0 %vm122_vm0, %v117_v8  ;;  %v273_v8 = vld [vmem:[#allocation5 + $0x8] sm:$0xff] }
  0x2b   :  { %616 = vmatmul.msk.f32.vlgmr.msra.gmra.mxu1 %vm122_vm0, %v112_v9  ;;  %266 = vmatpush.msra.mxu2 %v242_v12  ;;  %v272_v9 = vld [vmem:[#allocation5] sm:$0xff] }
  0x2c   :  { %v635_v14 = vld [vmem:[%s1149_s4] ss:$0 sm:$0xff]  ;;  %297 = vmatpush.msra.mxu3 %v273_v8 }
  0x2d   :  { %267 = vmatpush.msra.mxu2 %v241_v13  ;;  %v636_v2 = vld [vmem:[%s1150_s30] ss:$0 sm:$0xff]  ;;  %v366_v13 = vld [vmem:[%s1115_s14 + $0x18] sm:$0xff]  ;;  %s808_s30 = smov [#allocation7]  }
  0x2e   :  { %v637_v5 = vld [vmem:[%s1151_s2] ss:$0 sm:$0xff]  ;;  %298 = vmatpush.msra.mxu3 %v272_v9  ;;  %386 = vmatpush.msrb.mxu0 %v366_v13 }
  0x2f   :  { %v443_v9 = vld [vmem:[%s1119_s18] sm:$0xff]  ;;  %s573_s18 = sshll.u32 %s1125_s24, 4  ;;  %s574_s18 = int_to_ptr.hbm [resolvable:$true] %s573_s18 }
  0x30   :  { %467 = vmatpush.msrb.mxu2 %v443_v9 }
  0xa7   :  { %v143_v15 = vpop.f32.mrf.mxu0 }
  0xa8   :  { %v166_v16 = vpop.f32.mrf.mxu1 }
  0xa9   :  { %v167_v17 = vadd.f32 %v166_v16, %v143_v15  ;;  %v639_v15 = vld [vmem:[%s1112_s11] ss:$0 sm:$0xff]  ;;  %v364_v16 = vld [vmem:[%s1115_s14 + $0x8] sm:$0xff] }
  0xab   :  { %v173_v18 = vadd.f32 %v635_v14, %v167_v17  ;;  %v365_v14 = vld [vmem:[%s1115_s14 + $0x10] sm:$0xff]  ;;  %v363_v17 = vld [vmem:[%s1115_s14] sm:$0xff] }
  0xac   :  { %387 = vmatpush.msrb.mxu0 %v365_v14 }
  0xad   :  { %v617_v19 = vmul.f32 -1.442695, %v173_v18 }
  0xae   :  { %388 = vmatpush.msrb.mxu0 %v364_v16 }
  0xaf   :  { %648 = vpow2.f32 %v617_v19 }
  0xb0   :  { %389 = vmatpush.msrb.mxu0 %v363_v17 }
  0xb5   :  { %v649_v20 = vpop.eup %648 }
  0xb6   :  { %v177_v21 = vadd.f32 1.0, %v649_v20 }
  0xb8   :  { %650 = vrcp.f32 %v177_v21  ;;  %v189_v27 = vand.u32 2147483648, %v177_v21  ;;  %v187_v29 = vand.u32 2147483647, %v177_v21  ;;  %vm183_vm2 = vweird.f32 %v177_v21 }
  0xb9   :  { %652 = vrcp.f32 %v804_v22 }
  0xba   :  { %v190_v32 = vor.u32 1.1754944e-38, %v189_v27  ;;  %vm188_vm5 = vcmp.eq.f32.partialorder %v187_v29, 8.507059e+37 }
  0xbe   :  { %v651_v23 = vpop.eup %650 }
  0xbf   :  { %v179_v24 = vmul.f32 %v651_v23, %v177_v21  ;;  %v653_v25 = vpop.eup %652  ;;  %vm184_vm1 = vweird.f32 %v651_v23 }
  0xc0   :  { %v202_v30 = vmul.f32 4.0, %v653_v25  ;;  %vm185_vm3 = vmor %vm183_vm2, %vm184_vm1  ;;  %vm206_vm6 = vweird.f32 %v653_v25 }
  0xc1   :  { %v180_v26 = vsub.f32 1.0, %v179_v24 }
  0xc2   :  { %v203_v34 = vsub.f32 1.0, %v202_v30 }
  0xc3   :  { %v181_v28 = vmul.f32 %v651_v23, %v180_v26 }
  0xc4   :  { %v204_v38 = vmul.f32 %v653_v25, %v203_v34 }
  0xc5   :  { %v182_v31 = vadd.f32 %v651_v23, %v181_v28 }
  0xc6   :  { %v205_v41 = vadd.f32 %v653_v25, %v204_v38 }
  0xc7   :  { %v186_v33 = vsel %vm185_vm3, %v651_v23, %v182_v31  ;;  %vm562_vm3 = vcmask 60416  }
  0xc8   :  { %v191_v35 = vsel %vm188_vm5, %v190_v32, %v186_v33  ;;  %v998_v44 = vsel %vm206_vm6, %v653_v25, %v205_v41 }
  0xc9   :  { %v194_v36 = vsel %vm193_vm4, %v191_v35, 0.0 }
  0xca   :  { %v195_v37 = vrot.slane %v194_v36, 4 }
  0xcc   :  { %v196_v39 = vadd.f32 %v195_v37, %v194_v36 }
  0xce   :  { %v197_v40 = vrot.slane %v196_v39, 2 }
  0xd0   :  { %v198_v42 = vadd.f32 %v197_v40, %v196_v39 }
  0xd2   :  { %v199_v43 = vrot.slane %v198_v42, 1 }
  0xd4   :  { %v200_v45 = vadd.f32 %v199_v43, %v198_v42 }
  0xd6   :  { %v208_v46 = vmul.f32 %v998_v44, %v200_v45 }
  0xd8   :  { %v209_v47 = vsub.f32 %v191_v35, %v208_v46 }
  0xda   :  { %v210_v48 = vmul.f32 %v209_v47, %v209_v47 }
  0xdc   :  { %v211_v49 = vsel %vm193_vm4, %v210_v48, 0.0 }
  0xdd   :  { %v212_v50 = vrot.slane %v211_v49, 4 }
  0xdf   :  { %v213_v51 = vadd.f32 %v212_v50, %v211_v49  ;;  %v397_v50 = vld [vmem:[%s1117_s16 + $0x18] sm:$0xff] }
  0xe0   :  { %418 = vmatpush.msrb.mxu1 %v397_v50 }
  0xe1   :  { %v214_v52 = vrot.slane %v213_v51, 2 }
  0xe3   :  { %v215_v53 = vadd.f32 %v214_v52, %v213_v51  ;;  %v396_v51 = vld [vmem:[%s1117_s16 + $0x10] sm:$0xff] }
  0xe4   :  { %419 = vmatpush.msrb.mxu1 %v396_v51 }
  0xe5   :  { %v216_v54 = vrot.slane %v215_v53, 1 }
  0xe7   :  { %v217_v57 = vadd.f32 %v216_v54, %v215_v53  ;;  %v395_v53 = vld [vmem:[%s1117_s16 + $0x8] sm:$0xff] }
  0xe8   :  { %420 = vmatpush.msrb.mxu1 %v395_v53 }
  0xe9   :  { %v218_v58 = vmul.f32 %v217_v57, %v998_v44 }
  0xea   :  { %421 = vmatpush.msrb.mxu1 %v394_v55 }
  0xeb   :  { %v219_v59 = vadd.f32 1e-05, %v218_v58 }
  0xed   :  { %654 = vrsqrt.f32 %v219_v59  ;;  %vm226_vm8 = vweird.f32 %v219_v59 }
  0xf3   :  { %v655_v60 = vpop.eup %654 }
  0xf4   :  { %v221_v61 = vmul.f32 %v655_v60, %v219_v59  ;;  %vm227_vm7 = vweird.f32 %v655_v60 }
  0xf5   :  { %vm228_vm9 = vmor %vm226_vm8, %vm227_vm7  ;;  %vm448_vm7 = vcmask 64512  }
  0xf6   :  { %v222_v62 = vmul.f32 %v655_v60, %v221_v61 }
  0xf8   :  { %v223_v63 = vmul.f32 0.5, %v222_v62 }
  0xfa   :  { %v224_v0 = vsub.f32 1.5, %v223_v63  ;;  %v640_v63 = vld [vmem:[%s1113_s12] ss:$0 sm:$0xff] }
  0xfc   :  { %v225_v1 = vmul.f32 %v655_v60, %v224_v0 }
  0xfe   :  { %v229_v3 = vsel %vm228_vm9, %v655_v60, %v225_v1 }
  0xff   :  { %v230_v4 = vmul.f32 %v229_v3, %v209_v47 }
 0x101   :  { %v235_v6 = vmul.f32 %v636_v2, %v230_v4  ;;  %v641_v2 = vld [vmem:[%s1114_s13] ss:$0 sm:$0xff]  ;;  %s595_s13 = sshll.u32 %s1127_s26, 4  ;;  %s596_s13 = int_to_ptr.hbm [resolvable:$true] %s595_s13 }
 0x103   :  { %v240_v7 = vadd.f32 %v637_v5, %v235_v6  ;;  %v642_v6 = vld [vmem:[%s1116_s15] ss:$0 sm:$0xff]  ;;  %s571_s15 = sshll.u32 %s808_s30, 4  ;;  %s572_s15 = int_to_ptr.vmem [resolvable:$true] %s571_s15 }
 0x105   :  { %618 = vmatmul.msk.f32.vlgmr.msra.gmra.mxu2 %vm122_vm0, %v240_v7 }
 0x188   :  { %v269_v11 = vpop.f32.mrf.mxu2 }
 0x189   :  { %v270_v12 = vadd.f32 %v638_v10, %v269_v11  ;;  %v643_v10 = vld [vmem:[%s1118_s17] ss:$0 sm:$0xff] }
 0x18b   :  { %619 = vmatmul.msk.f32.vlgmr.msra.gmra.mxu3 %vm122_vm0, %v270_v12 }
 0x20e   :  { %v300_v18 = vpop.f32.mrf.mxu3 }
 0x20f   :  { %v301_v19 = vadd.f32 %v639_v15, %v300_v18 }
 0x211   :  { %v620_v20 = vmul.f32 -1.442695, %v301_v19 }
 0x213   :  { %656 = vpow2.f32 %v620_v20 }
 0x219   :  { %v657_v21 = vpop.eup %656 }
 0x21a   :  { %v306_v22 = vadd.f32 1.0, %v657_v21 }
 0x21c   :  { %658 = vrcp.f32 %v306_v22  ;;  %v318_v26 = vand.u32 2147483648, %v306_v22  ;;  %v316_v28 = vand.u32 2147483647, %v306_v22  ;;  %vm312_vm11 = vweird.f32 %v306_v22 }
 0x21e   :  { %v319_v30 = vor.u32 1.1754944e-38, %v318_v26  ;;  %vm317_vm14 = vcmp.eq.f32.partialorder %v316_v28, 8.507059e+37  ;;  %v534_v28 = vld [vmem:[%s1123_s22 + $0x18] sm:$0xff] }
 0x21f   :  { %554 = vmatpush.msrb.mxu3 %v534_v28 }
 0x222   :  { %v659_v23 = vpop.eup %658 }
 0x223   :  { %v308_v24 = vmul.f32 %v659_v23, %v306_v22  ;;  %vm313_vm10 = vweird.f32 %v659_v23 }
 0x224   :  { %vm314_vm12 = vmor %vm312_vm11, %vm313_vm10 }
 0x225   :  { %v309_v25 = vsub.f32 1.0, %v308_v24 }
 0x227   :  { %v310_v27 = vmul.f32 %v659_v23, %v309_v25 }
 0x229   :  { %v311_v29 = vadd.f32 %v659_v23, %v310_v27 }
 0x22b   :  { %v315_v31 = vsel %vm314_vm12, %v659_v23, %v311_v29  ;;  %v440_v23 = vld [vmem:[#allocation2] sm:$0xf]  ;;  %v533_v29 = vld [vmem:[%s1123_s22 + $0x10] sm:$0xff] }
 0x22c   :  { %v320_v32 = vsel %vm317_vm14, %v319_v30, %v315_v31  ;;  %v644_v30 = vld [vmem:[%s1120_s19] ss:$0 sm:$0xff]  ;;  %v532_v31 = vld [vmem:[%s1123_s22 + $0x8] sm:$0xff]  ;;  %555 = vmatpush.msrb.mxu3 %v533_v29 }
 0x22d   :  { %v323_v33 = vsel %vm322_vm13, %v320_v32, 0.0 }
 0x22e   :  { %v324_v34 = vrot.slane %v323_v33, 4  ;;  %556 = vmatpush.msrb.mxu3 %v532_v31 }
 0x230   :  { %v325_v35 = vadd.f32 %v324_v34, %v323_v33 }
 0x232   :  { %v326_v36 = vrot.slane %v325_v35, 2 }
 0x234   :  { %v327_v37 = vadd.f32 %v326_v36, %v325_v35 }
 0x236   :  { %v328_v38 = vrot.slane %v327_v37, 1 }
 0x238   :  { %v329_v39 = vadd.f32 %v328_v38, %v327_v37 }
 0x23a   :  { %v330_v40 = vmul.f32 %v329_v39, %v998_v44 }
 0x23c   :  { %v331_v41 = vsub.f32 %v320_v32, %v330_v40  ;;  %v531_v32 = vld [vmem:[%s1123_s22] sm:$0xff] }
 0x23d   :  { %557 = vmatpush.msrb.mxu3 %v531_v32 }
 0x23e   :  { %v332_v42 = vmul.f32 %v331_v41, %v331_v41 }
 0x240   :  { %v333_v43 = vsel %vm322_vm13, %v332_v42, 0.0 }
 0x241   :  { %v334_v45 = vrot.slane %v333_v43, 4 }
 0x243   :  { %v335_v46 = vadd.f32 %v334_v45, %v333_v43 }
 0x245   :  { %v336_v47 = vrot.slane %v335_v46, 2 }
 0x247   :  { %v337_v48 = vadd.f32 %v336_v47, %v335_v46 }
 0x249   :  { %v338_v49 = vrot.slane %v337_v48, 1 }
 0x24b   :  { %v339_v52 = vadd.f32 %v338_v49, %v337_v48 }
 0x24d   :  { %v340_v54 = vmul.f32 %v339_v52, %v998_v44 }
 0x24f   :  { %v341_v56 = vadd.f32 1e-05, %v340_v54 }
 0x251   :  { %660 = vrsqrt.f32 %v341_v56  ;;  %vm348_vm1 = vweird.f32 %v341_v56 }
 0x257   :  { %v661_v57 = vpop.eup %660 }
 0x258   :  { %v343_v58 = vmul.f32 %v661_v57, %v341_v56  ;;  %vm349_vm15 = vweird.f32 %v661_v57 }
 0x259   :  { %vm350_vm2 = vmor %vm348_vm1, %vm349_vm15 }
 0x25a   :  { %v344_v59 = vmul.f32 %v661_v57, %v343_v58 }
 0x25c   :  { %v345_v60 = vmul.f32 0.5, %v344_v59 }
 0x25e   :  { %v346_v61 = vsub.f32 1.5, %v345_v60 }
 0x260   :  { %v347_v62 = vmul.f32 %v661_v57, %v346_v61 }
 0x262   :  { %v351_v0 = vsel %vm350_vm2, %v661_v57, %v347_v62 }
 0x263   :  { %v352_v1 = vmul.f32 %v351_v0, %v331_v41 }
 0x265   :  { %v357_v3 = vmul.f32 %v640_v63, %v352_v1 }
 0x267   :  { %v362_v4 = vadd.f32 %v641_v2, %v357_v3 }
 0x269   :  { %621 = vmatmul.msk.f32.vlgmr.msrb.gmra.mxu0 %vm122_vm0, %v362_v4  ;;  %402 = vrot.lane.b32.xlu0 %v362_v4, %s805_s28  ;;  %s584_s28 = sshll.u32 %s1126_s25, 4  ;;  %s585_s28 = int_to_ptr.hbm [resolvable:$true] %s584_s28 }
 0x2db   :  { %v403_v5 = vpop.permute.xlu0 %402 }
 0x2dc   :  { %622 = vmatmul.msk.f32.vlgmr.msrb.gmra.mxu1 %vm122_vm0, %v403_v5 }
 0x2e6   :  { %v391_v7 = vpop.f32.mrf.mxu0 }
 0x2e7   :  { %v392_v8 = vadd.f32 %v642_v6, %v391_v7 }
 0x2e9   :  { %564 = vst.msk [vmem:[#allocation8] sm:$0xf] %vm562_vm3, %v392_v8 }
 0x2ea   :  { %587 = dma.vmem_to_hbm [thread:$0]  %s583_s7, 64, %s585_s28, [#allocation9]  }
 0x359   :  { %v423_v11 = vpop.f32.mrf.mxu1 }
 0x35a   :  { %v424_v12 = vadd.f32 %v643_v10, %v423_v11  ;;  %v645_v10 = vld [vmem:[%s1121_s20] ss:$0 sm:$0xff]  ;;  %s807_s20 = smov [#allocation10]  }
 0x35b   :  { %s593_s4 = sshll.u32 %s807_s20, 4  ;;  %s594_s4 = int_to_ptr.vmem [resolvable:$true] %s593_s4 }
 0x35c   :  { %v427_v13 = vmin.f32 %v424_v12, 20.0  ;;  %vm426_vm6 = vcmp.gt.f32.partialorder %v424_v12, 20.0 }
 0x35e   :  { %v428_v14 = vmul.f32 1.442695, %v427_v13 }
 0x360   :  { %662 = vpow2.f32 %v428_v14 }
 0x366   :  { %v663_v15 = vpop.eup %662 }
 0x367   :  { %v430_v16 = vadd.f32 1.0, %v663_v15  ;;  %v433_v17 = vmul.f32 -0.5, %v663_v15  ;;  %v436_v19 = vand.u32 2147483647, %v663_v15 }
 0x369   :  { %664 = vlog2.f32 %v430_v16  ;;  %v434_v18 = vadd.f32 1.0, %v433_v17  ;;  %vm437_vm5 = vcmp.lt.f32.partialorder %v436_v19, 0.0004427343 }
 0x36b   :  { %v435_v22 = vmul.f32 %v663_v15, %v434_v18  ;;  %v647_v15 = vld [vmem:[%s1124_s23] ss:$0 sm:$0xff] }
 0x36f   :  { %v665_v20 = vpop.eup %664 }
 0x370   :  { %v432_v21 = vmul.f32 0.6931472, %v665_v20 }
 0x372   :  { %v438_v24 = vsel %vm437_vm5, %v435_v22, %v432_v21 }
 0x373   :  { %v439_v25 = vsel %vm426_vm6, %v424_v12, %v438_v24 }
 0x374   :  { %v441_v26 = vmul.f32 %v440_v23, %v439_v25  ;;  %565 = vst.msk [vmem:[#allocation10] sm:$0xf] %vm562_vm3, %v439_v25 }
 0x375   :  { %598 = dma.vmem_to_hbm [thread:$0]  %s594_s4, 64, %s596_s13, [#allocation9]  }
 0x376   :  { %v442_v27 = vadd.f32 %v441_v26, %v392_v8 }
 0x378   :  { %623 = vmatmul.msk.f32.vlgmr.msrb.gmra.mxu2 %vm448_vm7, %v442_v27 }
 0x3fb   :  { %v469_v33 = vpop.f32.mrf.mxu2 }
 0x3fc   :  { %v470_v34 = vadd.f32 %v644_v30, %v469_v33 }
 0x3fe   :  { %v624_v35 = vmul.f32 -1.442695, %v470_v34 }
 0x400   :  { %666 = vpow2.f32 %v624_v35 }
 0x406   :  { %v667_v36 = vpop.eup %666 }
 0x407   :  { %v475_v37 = vadd.f32 1.0, %v667_v36 }
 0x409   :  { %668 = vrcp.f32 %v475_v37  ;;  %v487_v41 = vand.u32 2147483648, %v475_v37  ;;  %v485_v43 = vand.u32 2147483647, %v475_v37  ;;  %vm481_vm9 = vweird.f32 %v475_v37 }
 0x40b   :  { %v488_v46 = vor.u32 1.1754944e-38, %v487_v41  ;;  %vm486_vm11 = vcmp.eq.f32.partialorder %v485_v43, 8.507059e+37 }
 0x40f   :  { %v669_v38 = vpop.eup %668 }
 0x410   :  { %v477_v39 = vmul.f32 %v669_v38, %v475_v37  ;;  %vm482_vm8 = vweird.f32 %v669_v38 }
 0x411   :  { %vm483_vm10 = vmor %vm481_vm9, %vm482_vm8 }
 0x412   :  { %v478_v40 = vsub.f32 1.0, %v477_v39 }
 0x414   :  { %v479_v42 = vmul.f32 %v669_v38, %v478_v40 }
 0x416   :  { %v480_v45 = vadd.f32 %v669_v38, %v479_v42 }
 0x418   :  { %v484_v47 = vsel %vm483_vm10, %v669_v38, %v480_v45 }
 0x419   :  { %v489_v48 = vsel %vm486_vm11, %v488_v46, %v484_v47 }
 0x41a   :  { %v491_v49 = vsel %vm193_vm4, %v489_v48, 0.0 }
 0x41b   :  { %v492_v50 = vrot.slane %v491_v49, 4 }
 0x41d   :  { %v493_v51 = vadd.f32 %v492_v50, %v491_v49 }
 0x41f   :  { %v494_v52 = vrot.slane %v493_v51, 2 }
 0x421   :  { %v495_v53 = vadd.f32 %v494_v52, %v493_v51 }
 0x423   :  { %v496_v54 = vrot.slane %v495_v53, 1 }
 0x425   :  { %v497_v55 = vadd.f32 %v496_v54, %v495_v53 }
 0x427   :  { %v498_v56 = vmul.f32 %v497_v55, %v998_v44 }
 0x429   :  { %v499_v57 = vsub.f32 %v489_v48, %v498_v56 }
 0x42b   :  { %v500_v58 = vmul.f32 %v499_v57, %v499_v57 }
 0x42d   :  { %v501_v59 = vsel %vm193_vm4, %v500_v58, 0.0 }
 0x42e   :  { %v502_v60 = vrot.slane %v501_v59, 4 }
 0x430   :  { %v503_v61 = vadd.f32 %v502_v60, %v501_v59 }
 0x432   :  { %v504_v62 = vrot.slane %v503_v61, 2 }
 0x434   :  { %v505_v63 = vadd.f32 %v504_v62, %v503_v61 }
 0x436   :  { %v506_v0 = vrot.slane %v505_v63, 1 }
 0x438   :  { %v507_v1 = vadd.f32 %v506_v0, %v505_v63 }
 0x43a   :  { %v508_v2 = vmul.f32 %v507_v1, %v998_v44  ;;  %v646_v44 = vld [vmem:[%s1122_s21] ss:$0 sm:$0xff] }
 0x43c   :  { %v509_v3 = vadd.f32 1e-05, %v508_v2 }
 0x43e   :  { %670 = vrsqrt.f32 %v509_v3  ;;  %vm516_vm13 = vweird.f32 %v509_v3 }
 0x444   :  { %v671_v4 = vpop.eup %670 }
 0x445   :  { %v511_v5 = vmul.f32 %v671_v4, %v509_v3  ;;  %vm517_vm12 = vweird.f32 %v671_v4 }
 0x446   :  { %vm518_vm14 = vmor %vm516_vm13, %vm517_vm12 }
 0x447   :  { %v512_v6 = vmul.f32 %v671_v4, %v511_v5 }
 0x449   :  { %v513_v7 = vmul.f32 0.5, %v512_v6 }
 0x44b   :  { %v514_v8 = vsub.f32 1.5, %v513_v7 }
 0x44d   :  { %v515_v9 = vmul.f32 %v671_v4, %v514_v8 }
 0x44f   :  { %v519_v11 = vsel %vm518_vm14, %v671_v4, %v515_v9 }
 0x450   :  { %v520_v12 = vmul.f32 %v519_v11, %v499_v57 }
 0x452   :  { %v525_v13 = vmul.f32 %v645_v10, %v520_v12 }
 0x454   :  { %v530_v14 = vadd.f32 %v646_v44, %v525_v13 }
 0x456   :  { %625 = vmatmul.msk.f32.vlgmr.msrb.gmra.mxu3 %vm122_vm0, %v530_v14 }
 0x4d9   :  { %v559_v16 = vpop.f32.mrf.mxu3 }
 0x4da   :  { %v560_v17 = vadd.f32 %v647_v15, %v559_v16 }
 0x4dc   :  { %563 = vst.msk [vmem:[#allocation7] sm:$0xf] %vm562_vm3, %v560_v17 }
 0x4dd   :  { %576 = dma.vmem_to_hbm [thread:$0]  %s572_s15, 64, %s574_s18, [#allocation4]  }
 0x4de   :  { %796 = dma.done.wait [#allocation4], 64  }
 0x4df   :  { %797 = vsyncadd [#allocation4], 4294967232 }
 0x4e0   :  { %798 = dma.done.wait [#allocation9], 128  }
 0x4e1   :  { %799 = vsyncadd [#allocation9], 4294967168 }
 0x4e2   :  { %611 = vsyncpa [#allocation3], 1 }
 0x4e3   :  { %612 = vsyncpa [#allocation6], 1 }
 0x4e4   :  { %613 = vsyncpa [#allocation4], 1 }
 0x4e5   :  { %614 = vsyncpa [#allocation9], 1 }

// kernel: generator_forward.2
= control target key start
LH: loop header
LB: loop body
LE: loop exit
PB: predicated region body
PF: predicated region fallthrough
CT: control target
= control target key end

     0   :  { %s1906_s0 = inlined_call_operand.hbm [shape: f32[32,16], index: 0, kind: input, shape index: {}]   ;;  %s1907_s1 = inlined_call_operand.hbm [shape: f32[16,32], index: 1, kind: input, shape index: {}]   ;;  %s1908_s2 = inlined_call_operand.vmem [shape: f32[1,32], index: 2, kind: input, shape index: {}]   ;;  %s1909_s3 = inlined_call_operand.vmem [shape: f32[1,32], index: 3, kind: input, shape index: {}]   ;;  %s1910_s4 = inlined_call_operand.vmem [shape: f32[1,32], index: 4, kind: input, shape index: {}]   ;;  %s1911_s5 = inlined_call_operand.hbm [shape: f32[32,32], index: 5, kind: input, shape index: {}]   ;;  %s1912_s6 = inlined_call_operand.vmem [shape: f32[1,32], index: 6, kind: input, shape index: {}]   ;;  %s1913_s7 = inlined_call_operand.hbm [shape: f32[32,96], index: 7, kind: input, shape index: {}]   ;;  %s1914_s8 = inlined_call_operand.hbm [shape: f32[32,96], index: 8, kind: input, shape index: {}]   ;;  %s1915_s9 = inlined_call_operand.vmem [shape: f32[1,96], index: 9, kind: input, shape index: {}]   ;;  %s1916_s10 = inlined_call_operand.vmem [shape: f32[1,96], index: 10, kind: input, shape index: {}]   ;;  %s1917_s11 = inlined_call_operand.hbm [shape: f32[32,96], index: 11, kind: input, shape index: {}]   ;;  %s1918_s12 = inlined_call_operand.hbm [shape: f32[32,96], index: 12, kind: input, shape index: {}]   ;;  %s1919_s13 = inlined_call_operand.hbm [shape: f32[1,96], index: 13, kind: input, shape index: {}]   ;;  %s1920_s14 = inlined_call_operand.hbm [shape: f32[1,96], index: 14, kind: input, shape index: {}]   ;;  %s1921_s15 = inlined_call_operand.vmem [shape: f32[4,32], index: 15, kind: output, shape index: {0}]   ;;  %s1922_s16 = inlined_call_operand.vmem [shape: f32[4,32], index: 16, kind: output, shape index: {1}]  }
   0x1   :  { %1923 = sst [smem:[#allocation21_spill]] %s1906_s0 }
   0x2   :  { %22 = vsyncpa [#allocation3], 0 }
   0x3   :  { %23 = vsyncpa [#allocation5], 0 }
   0x4   :  { %24 = vsyncpa [#allocation8], 0 }
   0x5   :  { %25 = vsyncpa [#allocation11], 0 }
   0x6   :  { %26 = vsyncpa [#allocation14], 0  ;;  %s44_s23 = sshll.u32 %s1907_s1, 4  ;;  %s1536_s24 = smov [#allocation4]   ;;  %s45_s23 = int_to_ptr.hbm [resolvable:$true] %s44_s23 }
   0x7   :  { %s46_s25 = sshll.u32 %s1536_s24, 4  ;;  %s78_s28 = sshll.u32 %s1913_s7, 4  ;;  %s47_s25 = int_to_ptr.vmem [resolvable:$true] %s46_s25  ;;  %s79_s28 = int_to_ptr.hbm [resolvable:$true] %s78_s28 }
   0x8   :  { %s1537_s29 = smov 128   ;;  %s1538_s30 = smov 8  }
   0x9   :  { %52 = dma.hbm_to_vmem [thread:$0]  %s45_s23, 256, %s47_s25, [#allocation5], %s1537_s29, %s1537_s29, %s1538_s30  }
   0xa   :  { %s1539_s0 = smov [#allocation7]   ;;  %s108_s1 = sshll.u32 %s1917_s11, 4  ;;  %s109_s1 = int_to_ptr.hbm [resolvable:$true] %s108_s1 }
   0xb   :  { %s80_s17 = sshll.u32 %s1539_s0, 4  ;;  %s135_s21 = sshll.u32 %s1919_s13, 4  ;;  %s81_s17 = int_to_ptr.vmem [resolvable:$true] %s80_s17  ;;  %s136_s21 = int_to_ptr.hbm [resolvable:$true] %s135_s21 }
   0xc   :  { %86 = dma.hbm_to_vmem [thread:$0]  %s79_s28, 512, %s81_s17, [#allocation8], %s1537_s29, %s1537_s29, %s1538_s30  }
   0xd   :  { %s1540_s22 = smov [#allocation10]   ;;  %s1541_s23 = smov [#allocation13]  }
   0xe   :  { %s110_s24 = sshll.u32 %s1540_s22, 4  ;;  %s137_s11 = sshll.u32 %s1541_s23, 4  ;;  %s111_s24 = int_to_ptr.vmem [resolvable:$true] %s110_s24  ;;  %s138_s11 = int_to_ptr.vmem [resolvable:$true] %s137_s11 }
   0xf   :  { %116 = dma.hbm_to_vmem [thread:$0]  %s109_s1, 512, %s111_s24, [#allocation11], %s1537_s29, %s1537_s29, %s1538_s30  }
  0x10   :  { %s1924_s27 = sld [smem:[#allocation21_spill]]  ;;  %s63_s13 = sshll.u32 %s1911_s5, 4  ;;  %s64_s13 = int_to_ptr.hbm [resolvable:$true] %s63_s13 }
  0x11   :  { %140 = dma.hbm_to_vmem [thread:$0]  %s136_s21, 16, %s138_s11, [#allocation14]  }
  0x12   :  { %s1542_s18 = smov [#allocation2]   ;;  %s1543_s1 = smov [#allocation6]  }
  0x13   :  { %s33_s19 = sshll.u32 %s1542_s18, 4  ;;  %s65_s7 = sshll.u32 %s1543_s1, 4  ;;  %s34_s19 = int_to_ptr.vmem [resolvable:$true] %s33_s19  ;;  %s66_s7 = int_to_ptr.vmem [resolvable:$true] %s65_s7 }
  0x14   :  { %s91_s24 = sshll.u32 %s1914_s8, 4  ;;  %s121_s23 = sshll.u32 %s1918_s12, 4  ;;  %s92_s24 = int_to_ptr.hbm [resolvable:$true] %s91_s24  ;;  %s122_s23 = int_to_ptr.hbm [resolvable:$true] %s121_s23 }
  0x15   :  { %71 = dma.hbm_to_vmem [thread:$0]  %s64_s13, 512, %s66_s7, [#allocation5], %s1537_s29, %s1537_s29, %s1538_s30  }
  0x16   :  { %s31_s0 = sshll.u32 %s1924_s27, 4  ;;  %s1544_s11 = smov [#allocation9]   ;;  %s32_s0 = int_to_ptr.hbm [resolvable:$true] %s31_s0 }
  0x17   :  { %39 = dma.hbm_to_vmem [thread:$0]  %s32_s0, 512, %s34_s19, [#allocation3], %s1537_s29, %s1537_s29, %s1538_s30  }
  0x18   :  { %s93_s25 = sshll.u32 %s1544_s11, 4  ;;  %s1545_s26 = smov [#allocation12]   ;;  %s94_s25 = int_to_ptr.vmem [resolvable:$true] %s93_s25 }
  0x19   :  { %99 = dma.hbm_to_vmem [thread:$0]  %s92_s24, 512, %s94_s25, [#allocation8], %s1537_s29, %s1537_s29, %s1538_s30  }
  0x1a   :  { %s123_s8 = sshll.u32 %s1545_s26, 4  ;;  %s146_s28 = sshll.u32 %s1920_s14, 4  ;;  %s124_s8 = int_to_ptr.vmem [resolvable:$true] %s123_s8  ;;  %s147_s28 = int_to_ptr.hbm [resolvable:$true] %s146_s28 }
  0x1b   :  { %129 = dma.hbm_to_vmem [thread:$0]  %s122_s23, 512, %s124_s8, [#allocation11], %s1537_s29, %s1537_s29, %s1538_s30  }
  0x1c   :  { %s1546_s12 = smov [#allocation15]  }
  0x1d   :  { %s148_s17 = sshll.u32 %s1546_s12, 4  ;;  %s149_s17 = int_to_ptr.vmem [resolvable:$true] %s148_s17 }
  0x1e   :  { %151 = dma.hbm_to_vmem [thread:$0]  %s147_s28, 16, %s149_s17, [#allocation14]  }
  0x1f   :  { %1526 = dma.done.wait [#allocation3], 512  }
  0x20   :  { %1527 = vsyncadd [#allocation3], 4294966784 }
  0x21   :  { %1528 = dma.done.wait [#allocation5], 768  }
  0x22   :  { %1529 = vsyncadd [#allocation5], 4294966528 }
  0x23   :  { %1530 = dma.done.wait [#allocation8], 1024  }
  0x24   :  { %1531 = vsyncadd [#allocation8], 4294966272 }
  0x25   :  { %1532 = dma.done.wait [#allocation11], 1024  }
  0x26   :  { %1533 = vsyncadd [#allocation11], 4294966272 }
  0x27   :  { %1534 = dma.done.wait [#allocation14], 32  }
  0x28   :  { %1535 = vsyncadd [#allocation14], 4294967264  ;;  %v193_v0 = vld [vmem:[#allocation4 + $0x8] sm:$0xff]  ;;  %v192_v1 = vld [vmem:[#allocation4] sm:$0xff]  ;;  %vm198_vm0 = vcmask 130048   ;;  %v1547_v47 = vmov 32.0  }
  0x29   :  { %225 = vmatpush.msra.mxu0 %v193_v0  ;;  %v188_v2 = vld [vmem:[#allocation2] sm:$0xff]  ;;  %v189_v3 = vld [vmem:[#allocation2 + $0x8] sm:$0xff]  ;;  %v190_v4 = vld [vmem:[#allocation2 + $0x10] sm:$0xff]  ;;  %vm316_vm13 = vcmask 261120  }
  0x2a   :  { %v191_v5 = vld [vmem:[#allocation2 + $0x18] sm:$0xff]  ;;  %v1234_v6 = vld [vmem:[%s1908_s2] ss:$0 sm:$0xff]  ;;  %v394_v20 = vld [vmem:[#allocation6 + $0x18] sm:$0xff] }
  0x2b   :  { %226 = vmatpush.msra.mxu0 %v192_v1  ;;  %v393_v21 = vld [vmem:[#allocation6 + $0x10] sm:$0xff]  ;;  %423 = vmatpush.msra.mxu1 %v394_v20  ;;  %v392_v23 = vld [vmem:[#allocation6 + $0x8] sm:$0xff]  ;;  %v391_v26 = vld [vmem:[#allocation6] sm:$0xff] }
  0x2c   :  { %1185 = vmatmul.msk.f32.vlgmr.msra.gmra.mxu0 %vm198_vm0, %v188_v2 }
  0x2d   :  { %424 = vmatpush.msra.mxu1 %v393_v21 }
  0x2f   :  { %425 = vmatpush.msra.mxu1 %v392_v23 }
  0x31   :  { %426 = vmatpush.msra.mxu1 %v391_v26 }
  0x34   :  { %1186 = vmatmul.msk.f32.gmra.mxu0 %vm198_vm0, %v189_v3 }
  0x3c   :  { %1187 = vmatmul.msk.f32.gmra.mxu0 %vm198_vm0, %v190_v4 }
  0x44   :  { %1188 = vmatmul.msk.f32.gmra.mxu0 %vm198_vm0, %v191_v5 }
  0xa9   :  { %v228_v7 = vpop.f32.mrf.mxu0 }
  0xaa   :  { %v229_v8 = vadd.f32 %v1234_v6, %v228_v7 }
  0xac   :  { %v1189_v9 = vmul.f32 -1.442695, %v229_v8 }
  0xae   :  { %1242 = vpow2.f32 %v1189_v9 }
  0xb1   :  { %v231_v10 = vpop.f32.mrf.mxu0 }
  0xb2   :  { %v232_v11 = vadd.f32 %v1234_v6, %v231_v10 }
  0xb4   :  { %v1190_v12 = vmul.f32 -1.442695, %v232_v11  ;;  %v1243_v13 = vpop.eup %1242 }
  0xb5   :  { %v1687_v14 = vadd.f32 1.0, %v1243_v13 }
  0xb6   :  { %1244 = vpow2.f32 %v1190_v12 }
  0xb7   :  { %1246 = vrcp.f32 %v1687_v14  ;;  %vm261_vm5 = vweird.f32 %v1687_v14  ;;  %v267_v48 = vand.u32 2147483648, %v1687_v14  ;;  %v265_v51 = vand.u32 2147483647, %v1687_v14 }
  0xb9   :  { %v234_v15 = vpop.f32.mrf.mxu0  ;;  %v268_v62 = vor.u32 1.1754944e-38, %v267_v48  ;;  %vm266_vm12 = vcmp.eq.f32.partialorder %v265_v51, 8.507059e+37 }
  0xba   :  { %v235_v16 = vadd.f32 %v1234_v6, %v234_v15 }
  0xbc   :  { %v1245_v17 = vpop.eup %1244  ;;  %v1191_v18 = vmul.f32 -1.442695, %v235_v16 }
  0xbd   :  { %v253_v19 = vadd.f32 1.0, %v1245_v17  ;;  %v1247_v25 = vpop.eup %1246 }
  0xbe   :  { %1248 = vpow2.f32 %v1191_v18  ;;  %v257_v31 = vmul.f32 %v1247_v25, %v1687_v14  ;;  %vm262_vm3 = vweird.f32 %v1247_v25 }
  0xbf   :  { %1250 = vrcp.f32 %v253_v19  ;;  %vm276_vm2 = vweird.f32 %v253_v19  ;;  %v280_v43 = vand.u32 2147483647, %v253_v19  ;;  %v282_v44 = vand.u32 2147483648, %v253_v19  ;;  %vm1698_vm8 = vmor %vm261_vm5, %vm262_vm3 }
  0xc0   :  { %v258_v34 = vsub.f32 1.0, %v257_v31 }
  0xc1   :  { %v237_v22 = vpop.f32.mrf.mxu0  ;;  %v283_v57 = vor.u32 1.1754944e-38, %v282_v44  ;;  %vm281_vm10 = vcmp.eq.f32.partialorder %v280_v43, 8.507059e+37 }
  0xc2   :  { %v238_v24 = vadd.f32 %v1234_v6, %v237_v22  ;;  %v259_v39 = vmul.f32 %v1247_v25, %v258_v34 }
  0xc4   :  { %v1249_v27 = vpop.eup %1248  ;;  %v1192_v28 = vmul.f32 -1.442695, %v238_v24  ;;  %v260_v46 = vadd.f32 %v1247_v25, %v259_v39 }
  0xc5   :  { %v1251_v29 = vpop.eup %1250  ;;  %v254_v30 = vadd.f32 1.0, %v1249_v27 }
  0xc6   :  { %v272_v32 = vmul.f32 %v1251_v29, %v253_v19  ;;  %1252 = vpow2.f32 %v1192_v28  ;;  %vm277_vm1 = vweird.f32 %v1251_v29  ;;  %v264_v60 = vsel %vm1698_vm8, %v1247_v25, %v260_v46 }
  0xc7   :  { %1254 = vrcp.f32 %v254_v30  ;;  %vm1693_vm6 = vmor %vm276_vm2, %vm277_vm1  ;;  %v297_v50 = vand.u32 2147483648, %v254_v30  ;;  %vm291_vm7 = vweird.f32 %v254_v30  ;;  %v295_v53 = vand.u32 2147483647, %v254_v30 }
  0xc8   :  { %v273_v33 = vsub.f32 1.0, %v272_v32  ;;  %v269_v3 = vsel %vm266_vm12, %v268_v62, %v264_v60  ;;  %v447_v60 = vld [vmem:[#allocation9 + $0x18] sm:$0xff] }
  0xc9   :  { %v298_v61 = vor.u32 1.1754944e-38, %v297_v50  ;;  %vm296_vm11 = vcmp.eq.f32.partialorder %v295_v53, 8.507059e+37  ;;  %v317_v10 = vsel %vm316_vm13, %v269_v3, 0.0  ;;  %504 = vmatpush.msra.mxu3 %v447_v60  ;;  %862 = vmatpush.msrb.mxu1 %v447_v60 }
  0xca   :  { %v274_v36 = vmul.f32 %v1251_v29, %v273_v33 }
  0xcc   :  { %v1253_v35 = vpop.eup %1252  ;;  %v275_v41 = vadd.f32 %v1251_v29, %v274_v36 }
  0xcd   :  { %v1255_v37 = vpop.eup %1254  ;;  %v255_v38 = vadd.f32 1.0, %v1253_v35 }
  0xce   :  { %v287_v40 = vmul.f32 %v1255_v37, %v254_v30  ;;  %vm292_vm4 = vweird.f32 %v1255_v37  ;;  %v279_v55 = vsel %vm1693_vm6, %v1251_v29, %v275_v41 }
  0xcf   :  { %1256 = vrcp.f32 %v255_v38  ;;  %vm293_vm9 = vmor %vm291_vm7, %vm292_vm4  ;;  %v284_v63 = vsel %vm281_vm10, %v283_v57, %v279_v55  ;;  %v312_v2 = vand.u32 2147483648, %v255_v38  ;;  %v310_v6 = vand.u32 2147483647, %v255_v38 }
  0xd0   :  { %v288_v42 = vsub.f32 1.0, %v287_v40  ;;  %1258 = vrcp.f32 %v1547_v47  ;;  %v318_v7 = vsel %vm316_vm13, %v284_v63, 0.0  ;;  %vm306_vm15 = vweird.f32 %v255_v38 }
  0xd1   :  { %v313_v12 = vor.u32 1.1754944e-38, %v312_v2  ;;  %v319_v13 = vadd.f32 %v318_v7, %v317_v10  ;;  %vm311_vm1 = vcmp.eq.f32.partialorder %v310_v6, 8.507059e+37  ;;  %v1729_v2 = vld [vmem:[#allocation7 + $0x18] sm:$0xff]  ;;  %v1740_v10 = vld [vmem:[#allocation12 + $0x10] sm:$0xff] }
  0xd2   :  { %v289_v45 = vmul.f32 %v1255_v37, %v288_v42  ;;  %478 = vmatpush.msra.mxu2 %v1729_v2  ;;  %840 = vmatpush.msrb.mxu0 %v1729_v2 }
  0xd4   :  { %v290_v52 = vadd.f32 %v1255_v37, %v289_v45 }
  0xd5   :  { %v1257_v56 = vpop.eup %1256 }
  0xd6   :  { %v294_v58 = vsel %vm293_vm9, %v1255_v37, %v290_v52  ;;  %v302_v59 = vmul.f32 %v1257_v56, %v255_v38  ;;  %v1259_v0 = vpop.eup %1258  ;;  %vm307_vm14 = vweird.f32 %v1257_v56 }
  0xd7   :  { %v299_v4 = vsel %vm296_vm11, %v298_v61, %v294_v58  ;;  %v331_v8 = vmul.f32 32.0, %v1259_v0  ;;  %vm308_vm0 = vmor %vm306_vm15, %vm307_vm14  ;;  %vm335_vm2 = vweird.f32 %v1259_v0  ;;  %v446_v61 = vld [vmem:[#allocation9 + $0x10] sm:$0xff]  ;;  %vm643_vm15 = vcmask 253952  }
  0xd8   :  { %v303_v1 = vsub.f32 1.0, %v302_v59  ;;  %v320_v11 = vsel %vm316_vm13, %v299_v4, 0.0  ;;  %v1235_v59 = vld [vmem:[%s1909_s3] ss:$0 sm:$0xff]  ;;  %505 = vmatpush.msra.mxu3 %v446_v61  ;;  %863 = vmatpush.msrb.mxu1 %v446_v61 }
  0xd9   :  { %v321_v16 = vadd.f32 %v320_v11, %v319_v13  ;;  %v332_v18 = vsub.f32 1.0, %v331_v8  ;;  %v1736_v8 = vld [vmem:[#allocation12 + $0x18] sm:$0xff]  ;;  %v1746_v13 = vld [vmem:[#allocation12] sm:$0xff] }
  0xda   :  { %v304_v5 = vmul.f32 %v1257_v56, %v303_v1  ;;  %v445_v1 = vld [vmem:[#allocation9 + $0x8] sm:$0xff] }
  0xdb   :  { %v333_v21 = vmul.f32 %v1259_v0, %v332_v18  ;;  %506 = vmatpush.msra.mxu3 %v445_v1  ;;  %864 = vmatpush.msrb.mxu1 %v445_v1 }
  0xdc   :  { %v305_v9 = vadd.f32 %v1257_v56, %v304_v5  ;;  %v444_v5 = vld [vmem:[#allocation9] sm:$0xff] }
  0xdd   :  { %v334_v24 = vadd.f32 %v1259_v0, %v333_v21  ;;  %507 = vmatpush.msra.mxu3 %v444_v5  ;;  %865 = vmatpush.msrb.mxu1 %v444_v5  ;;  %v441_v21 = vld [vmem:[#allocation7 + $0x8] sm:$0xff] }
  0xde   :  { %v309_v14 = vsel %vm308_vm0, %v1257_v56, %v305_v9  ;;  %v1548_v9 = vmov 0.0  }
  0xdf   :  { %v314_v15 = vsel %vm311_vm1, %v313_v12, %v309_v14  ;;  %v336_v27 = vsel %vm335_vm2, %v1259_v0, %v334_v24  ;;  %v1236_v0 = vld [vmem:[%s1910_s4] ss:$0 sm:$0xff]  ;;  %508 = vmatmul.f32.vlgmr.msra.gmra.mxu3 %v1548_v9  ;;  %v1743_v12 = vld [vmem:[#allocation12 + $0x8] sm:$0xff] }
  0xe0   :  { %v322_v17 = vsel %vm316_vm13, %v314_v15, 0.0  ;;  %592 = vmatpush.msrb.mxu3 %v1736_v8  ;;  %v452_v24 = vld [vmem:[#allocation10 + $0x10] sm:$0xff] }
  0xe1   :  { %v323_v19 = vadd.f32 %v322_v17, %v321_v16 }
  0xe2   :  { %593 = vmatpush.msrb.mxu3 %v1740_v10 }
  0xe3   :  { %v324_v20 = vrot.slane %v323_v19, 4 }
  0xe4   :  { %594 = vmatpush.msrb.mxu3 %v1743_v12 }
  0xe5   :  { %v325_v22 = vadd.f32 %v324_v20, %v323_v19 }
  0xe6   :  { %595 = vmatpush.msrb.mxu3 %v1746_v13 }
  0xe7   :  { %v326_v23 = vrot.slane %v325_v22, 2  ;;  %596 = vmatmul.f32.vlgmr.msrb.gmra.mxu3 %v1548_v9 }
  0xe8   :  { %687 = vmatpush.msra.mxu3 %v447_v60 }
  0xe9   :  { %v327_v25 = vadd.f32 %v326_v23, %v325_v22  ;;  %v440_v22 = vld [vmem:[#allocation7] sm:$0xff]  ;;  %v453_v23 = vld [vmem:[#allocation10 + $0x18] sm:$0xff] }
  0xea   :  { %688 = vmatpush.msra.mxu3 %v446_v61 }
  0xeb   :  { %v328_v26 = vrot.slane %v327_v25, 1 }
  0xec   :  { %689 = vmatpush.msra.mxu3 %v445_v1 }
  0xed   :  { %v329_v28 = vadd.f32 %v328_v26, %v327_v25  ;;  %v451_v25 = vld [vmem:[#allocation10 + $0x8] sm:$0xff]  ;;  %v450_v26 = vld [vmem:[#allocation10] sm:$0xff] }
  0xee   :  { %690 = vmatpush.msra.mxu3 %v444_v5 }
  0xef   :  { %v337_v29 = vmul.f32 %v336_v27, %v329_v28 }
  0xf0   :  { %771 = vmatpush.msrb.mxu3 %v1736_v8 }
  0xf1   :  { %v338_v30 = vsub.f32 %v269_v3, %v337_v29  ;;  %v339_v31 = vsub.f32 %v284_v63, %v337_v29  ;;  %v1711_v32 = vsub.f32 %v299_v4, %v337_v29  ;;  %v1713_v33 = vsub.f32 %v314_v15, %v337_v29  ;;  %v1732_v3 = vld [vmem:[#allocation7 + $0x10] sm:$0xff] }
  0xf2   :  { %479 = vmatpush.msra.mxu2 %v1732_v3  ;;  %841 = vmatpush.msrb.mxu0 %v1732_v3 }
  0xf3   :  { %v342_v34 = vmul.f32 %v338_v30, %v338_v30  ;;  %v343_v35 = vmul.f32 %v339_v31, %v339_v31  ;;  %v344_v36 = vmul.f32 %v1711_v32, %v1711_v32  ;;  %v345_v37 = vmul.f32 %v1713_v33, %v1713_v33  ;;  %772 = vmatpush.msrb.mxu3 %v1740_v10 }
  0xf4   :  { %480 = vmatpush.msra.mxu2 %v441_v21  ;;  %842 = vmatpush.msrb.mxu0 %v441_v21 }
  0xf5   :  { %v346_v38 = vsel %vm316_vm13, %v342_v34, 0.0  ;;  %v347_v39 = vsel %vm316_vm13, %v343_v35, 0.0  ;;  %v349_v41 = vsel %vm316_vm13, %v344_v36, 0.0  ;;  %v351_v43 = vsel %vm316_vm13, %v345_v37, 0.0  ;;  %773 = vmatpush.msrb.mxu3 %v1743_v12 }
  0xf6   :  { %v348_v40 = vadd.f32 %v347_v39, %v346_v38  ;;  %481 = vmatpush.msra.mxu2 %v440_v22  ;;  %843 = vmatpush.msrb.mxu0 %v440_v22  ;;  %v1777_v38 = vld [vmem:[#allocation15] ss:$0 sm:$0xff] }
  0xf7   :  { %774 = vmatpush.msrb.mxu3 %v1746_v13 }
  0xf8   :  { %v350_v42 = vadd.f32 %v349_v41, %v348_v40  ;;  %1012 = vmatpush.msra.mxu0 %v1729_v2  ;;  %569 = vmatpush.msrb.mxu2 %v453_v23 }
  0xfa   :  { %v352_v44 = vadd.f32 %v351_v43, %v350_v42  ;;  %1013 = vmatpush.msra.mxu0 %v1732_v3  ;;  %570 = vmatpush.msrb.mxu2 %v452_v24  ;;  %v1788_v42 = vld [vmem:[%s1915_s9] ss:$0 sm:$0xff]  ;;  %s1550_s9 = smov 96  }
  0xfc   :  { %v353_v45 = vrot.slane %v352_v44, 4  ;;  %1014 = vmatpush.msra.mxu0 %v441_v21  ;;  %571 = vmatpush.msrb.mxu2 %v451_v25 }
  0xfe   :  { %v354_v46 = vadd.f32 %v353_v45, %v352_v44  ;;  %1015 = vmatpush.msra.mxu0 %v440_v22  ;;  %572 = vmatpush.msrb.mxu2 %v450_v26 }
 0x100   :  { %v355_v47 = vrot.slane %v354_v46, 2 }
 0x102   :  { %v356_v48 = vadd.f32 %v355_v47, %v354_v46 }
 0x104   :  { %v357_v49 = vrot.slane %v356_v48, 1 }
 0x106   :  { %v358_v50 = vadd.f32 %v357_v49, %v356_v48  ;;  %v1791_v49 = vld [vmem:[#allocation13] ss:$0 sm:$0xff] }
 0x108   :  { %v359_v51 = vmul.f32 %v358_v50, %v336_v27  ;;  %v1237_v27 = vld [vmem:[%s1912_s6] ss:$0 sm:$0xff]  ;;  %s1549_s6 = smov 64  }
 0x10a   :  { %v360_v52 = vadd.f32 1e-05, %v359_v51 }
 0x10c   :  { %1260 = vrsqrt.f32 %v360_v52  ;;  %vm367_vm4 = vweird.f32 %v360_v52 }
 0x112   :  { %v1261_v53 = vpop.eup %1260 }
 0x113   :  { %v362_v54 = vmul.f32 %v1261_v53, %v360_v52  ;;  %vm368_vm3 = vweird.f32 %v1261_v53 }
 0x114   :  { %vm369_vm5 = vmor %vm367_vm4, %vm368_vm3 }
 0x115   :  { %v363_v55 = vmul.f32 %v1261_v53, %v362_v54 }
 0x117   :  { %v364_v56 = vmul.f32 0.5, %v363_v55 }
 0x119   :  { %v365_v57 = vsub.f32 1.5, %v364_v56 }
 0x11b   :  { %v366_v58 = vmul.f32 %v1261_v53, %v365_v57 }
 0x11d   :  { %v370_v62 = vsel %vm369_vm5, %v1261_v53, %v366_v58 }
 0x11e   :  { %v371_v63 = vmul.f32 %v370_v62, %v338_v30  ;;  %v372_v7 = vmul.f32 %v370_v62, %v339_v31  ;;  %v373_v15 = vmul.f32 %v370_v62, %v1711_v32  ;;  %v374_v18 = vmul.f32 %v370_v62, %v1713_v33  ;;  %v1770_v31 = vld [vmem:[%s1916_s10] ss:$0 sm:$0xff] }
 0x120   :  { %v379_v4 = vmul.f32 %v1235_v59, %v371_v63  ;;  %v380_v11 = vmul.f32 %v1235_v59, %v372_v7  ;;  %v381_v16 = vmul.f32 %v1235_v59, %v373_v15  ;;  %v382_v19 = vmul.f32 %v1235_v59, %v374_v18 }
 0x122   :  { %v387_v6 = vadd.f32 %v1236_v0, %v379_v4  ;;  %v388_v14 = vadd.f32 %v1236_v0, %v380_v11  ;;  %v389_v17 = vadd.f32 %v1236_v0, %v381_v16  ;;  %v390_v20 = vadd.f32 %v1236_v0, %v382_v19 }
 0x124   :  { %1193 = vmatmul.msk.f32.vlgmr.msra.gmra.mxu1 %vm316_vm13, %v387_v6 }
 0x125   :  { %1034 = vmatpush.msra.mxu1 %v447_v60 }
 0x127   :  { %1035 = vmatpush.msra.mxu1 %v446_v61 }
 0x129   :  { %1036 = vmatpush.msra.mxu1 %v445_v1 }
 0x12b   :  { %1037 = vmatpush.msra.mxu1 %v444_v5 }
 0x12c   :  { %1194 = vmatmul.msk.f32.gmra.mxu1 %vm316_vm13, %v388_v14 }
 0x134   :  { %1195 = vmatmul.msk.f32.gmra.mxu1 %vm316_vm13, %v389_v17 }
 0x13c   :  { %1196 = vmatmul.msk.f32.gmra.mxu1 %vm316_vm13, %v390_v20 }
 0x162   :  { %v509_v32 = vpop.f32.mrf.mxu3 }
 0x163   :  { %v510_v33 = vadd.f32 %v1770_v31, %v509_v32 }
 0x165   :  { %533 = vrot.lane.b32.xlu0 %v510_v33, %s1549_s6 }
 0x16a   :  { %v597_v39 = vpop.f32.mrf.mxu3 }
 0x16b   :  { %v598_v40 = vadd.f32 %v1777_v38, %v597_v39 }
 0x16d   :  { %621 = vrot.lane.b32.xlu0 %v598_v40, %s1549_s6 }
 0x1a1   :  { %v428_v28 = vpop.f32.mrf.mxu1 }
 0x1a2   :  { %v429_v29 = vadd.f32 %v1237_v27, %v428_v28 }
 0x1a4   :  { %1197 = vmatmul.msk.f32.vlgmr.msra.gmra.mxu2 %vm316_vm13, %v429_v29 }
 0x1a5   :  { %665 = vmatpush.msra.mxu2 %v1729_v2 }
 0x1a7   :  { %666 = vmatpush.msra.mxu2 %v1732_v3 }
 0x1a9   :  { %v431_v30 = vpop.f32.mrf.mxu1  ;;  %667 = vmatpush.msra.mxu2 %v441_v21 }
 0x1aa   :  { %v432_v41 = vadd.f32 %v1237_v27, %v431_v30 }
 0x1ab   :  { %668 = vmatpush.msra.mxu2 %v440_v22 }
 0x1b1   :  { %v434_v34 = vpop.f32.mrf.mxu1 }
 0x1b2   :  { %v435_v35 = vadd.f32 %v1237_v27, %v434_v34 }
 0x1b4   :  { %1207 = vmatmul.msk.f32.vlgmr.msrb.gmra.mxu0 %vm316_vm13, %v435_v35 }
 0x1b9   :  { %v437_v36 = vpop.f32.mrf.mxu1 }
 0x1ba   :  { %v438_v37 = vadd.f32 %v1237_v27, %v437_v36 }
 0x1bc   :  { %1199 = vmatmul.msk.f32.vlgmr.msrb.gmra.mxu2 %vm316_vm13, %v438_v37  ;;  %1213 = vmatmul.msk.f32.vlgmr.msra.gmra.mxu0 %vm316_vm13, %v438_v37 }
 0x1bd   :  { %749 = vmatpush.msrb.mxu2 %v453_v23 }
 0x1bf   :  { %750 = vmatpush.msrb.mxu2 %v452_v24 }
 0x1c1   :  { %751 = vmatpush.msrb.mxu2 %v451_v25 }
 0x1c3   :  { %752 = vmatpush.msrb.mxu2 %v450_v26 }
 0x1c4   :  { %1201 = vmatmul.msk.f32.vlgmr.msra.gmra.mxu2 %vm316_vm13, %v432_v41 }
 0x1c5   :  { %921 = vmatpush.msra.mxu2 %v453_v23 }
 0x1c7   :  { %922 = vmatpush.msra.mxu2 %v452_v24 }
 0x1c9   :  { %923 = vmatpush.msra.mxu2 %v451_v25 }
 0x1cb   :  { %924 = vmatpush.msra.mxu2 %v450_v26 }
 0x1cc   :  { %1204 = vmatmul.msk.f32.vlgmr.msrb.gmra.mxu2 %vm316_vm13, %v435_v35 }
 0x1cd   :  { %1093 = vmatpush.msrb.mxu2 %v453_v23 }
 0x1cf   :  { %1094 = vmatpush.msrb.mxu2 %v452_v24 }
 0x1d1   :  { %1095 = vmatpush.msrb.mxu2 %v451_v25 }
 0x1d3   :  { %1096 = vmatpush.msrb.mxu2 %v450_v26 }
 0x1d4   :  { %1210 = vmatmul.msk.f32.vlgmr.msra.gmra.mxu2 %vm316_vm13, %v432_v41 }
 0x1d7   :  { %v534_v61 = vpop.permute.xlu0 %533 }
 0x1dc   :  { %1216 = vmatmul.msk.f32.vlgmr.msrb.gmra.mxu2 %vm316_vm13, %v429_v29 }
 0x1df   :  { %v622_v15 = vpop.permute.xlu0 %621 }
 0x227   :  { %v483_v43 = vpop.f32.mrf.mxu2 }
 0x228   :  { %v484_v44 = vadd.f32 %v1788_v42, %v483_v43 }
 0x22a   :  { %v512_v45 = vadd.f32 %v510_v33, %v484_v44 }
 0x22c   :  { %v1198_v46 = vmul.f32 -1.442695, %v512_v45 }
 0x22e   :  { %1262 = vpow2.f32 %v1198_v46 }
 0x234   :  { %v1263_v47 = vpop.eup %1262 }
 0x235   :  { %v516_v48 = vadd.f32 1.0, %v1263_v47 }
 0x237   :  { %1264 = vrcp.f32 %v516_v48  ;;  %v528_v55 = vand.u32 2147483648, %v516_v48  ;;  %v526_v58 = vand.u32 2147483647, %v516_v48  ;;  %vm522_vm7 = vweird.f32 %v516_v48 }
 0x239   :  { %v529_v62 = vor.u32 1.1754944e-38, %v528_v55  ;;  %vm527_vm9 = vcmp.eq.f32.partialorder %v526_v58, 8.507059e+37 }
 0x23d   :  { %v1265_v50 = vpop.eup %1264 }
 0x23e   :  { %v518_v51 = vmul.f32 %v1265_v50, %v516_v48  ;;  %vm523_vm6 = vweird.f32 %v1265_v50 }
 0x23f   :  { %v574_v52 = vpop.f32.mrf.mxu2  ;;  %vm524_vm8 = vmor %vm522_vm7, %vm523_vm6 }
 0x240   :  { %v575_v53 = vadd.f32 %v1791_v49, %v574_v52  ;;  %v519_v54 = vsub.f32 1.0, %v518_v51 }
 0x242   :  { %v600_v56 = vadd.f32 %v598_v40, %v575_v53  ;;  %v520_v57 = vmul.f32 %v1265_v50, %v519_v54 }
 0x244   :  { %v1200_v59 = vmul.f32 -1.442695, %v600_v56  ;;  %v521_v60 = vadd.f32 %v1265_v50, %v520_v57 }
 0x246   :  { %1266 = vpow2.f32 %v1200_v59  ;;  %v525_v63 = vsel %vm524_vm8, %v1265_v50, %v521_v60 }
 0x247   :  { %v530_v0 = vsel %vm527_vm9, %v529_v62, %v525_v63  ;;  %v670_v45 = vpop.f32.mrf.mxu2 }
 0x248   :  { %v536_v1 = vmul.f32 %v534_v61, %v530_v0  ;;  %v543_v26 = vsub.f32 1.0, %v530_v0  ;;  %v549_v28 = vmul.f32 0.0, %v530_v0 }
 0x24a   :  { %538 = vrot.lane.b32.xlu1 %v536_v1, %s1549_s6 }
 0x24c   :  { %v1267_v2 = vpop.eup %1266 }
 0x24d   :  { %v604_v3 = vadd.f32 1.0, %v1267_v2 }
 0x24f   :  { %1268 = vrcp.f32 %v604_v3  ;;  %v616_v7 = vand.u32 2147483648, %v604_v3  ;;  %v614_v11 = vand.u32 2147483647, %v604_v3  ;;  %vm610_vm11 = vweird.f32 %v604_v3  ;;  %v754_v46 = vpop.f32.mrf.mxu2 }
 0x251   :  { %v617_v16 = vor.u32 1.1754944e-38, %v616_v7  ;;  %vm615_vm14 = vcmp.eq.f32.partialorder %v614_v11, 8.507059e+37 }
 0x255   :  { %v1269_v4 = vpop.eup %1268 }
 0x256   :  { %v606_v5 = vmul.f32 %v1269_v4, %v604_v3  ;;  %vm611_vm10 = vweird.f32 %v1269_v4 }
 0x257   :  { %vm612_vm12 = vmor %vm610_vm11, %vm611_vm10 }
 0x258   :  { %v607_v6 = vsub.f32 1.0, %v606_v5 }
 0x25a   :  { %v608_v9 = vmul.f32 %v1269_v4, %v607_v6 }
 0x25c   :  { %v609_v14 = vadd.f32 %v1269_v4, %v608_v9 }
 0x25e   :  { %v613_v17 = vsel %vm612_vm12, %v1269_v4, %v609_v14 }
 0x25f   :  { %v618_v18 = vsel %vm615_vm14, %v617_v16, %v613_v17 }
 0x260   :  { %v624_v19 = vmul.f32 %v622_v15, %v618_v18  ;;  %v631_v32 = vsub.f32 1.0, %v618_v18  ;;  %v637_v34 = vmul.f32 0.0, %v618_v18 }
 0x262   :  { %626 = vrot.lane.b32.xlu1 %v624_v19, %s1549_s6 }
 0x2bc   :  { %v539_v20 = vpop.permute.xlu1 %538 }
 0x2bd   :  { %v541_v21 = vadd.f32 %v539_v20, %v484_v44 }
 0x2bf   :  { %1270 = vtanh.f32 %v541_v21 }
 0x2c5   :  { %v1271_v22 = vpop.eup %1270 }
 0x2c6   :  { %545 = vrot.lane.b32.xlu2 %v1271_v22, %s1550_s9 }
 0x2d4   :  { %v627_v23 = vpop.permute.xlu1 %626 }
 0x2d5   :  { %v629_v24 = vadd.f32 %v627_v23, %v575_v53 }
 0x2d7   :  { %1272 = vtanh.f32 %v629_v24 }
 0x2dd   :  { %v1273_v25 = vpop.eup %1272 }
 0x2de   :  { %633 = vrot.lane.b32.xlu2 %v1273_v25, %s1550_s9 }
 0x320   :  { %v546_v27 = vpop.permute.xlu2 %545 }
 0x321   :  { %v548_v29 = vmul.f32 %v546_v27, %v543_v26 }
 0x323   :  { %v1798_v30 = vadd.f32 %v549_v28, %v548_v29 }
 0x325   :  { %640 = vrot.lane.b32.xlu0 %v1798_v30, %s1550_s9 }
 0x338   :  { %v634_v33 = vpop.permute.xlu2 %633 }
 0x339   :  { %v636_v35 = vmul.f32 %v634_v33, %v631_v32 }
 0x33b   :  { %v1802_v36 = vadd.f32 %v637_v34, %v636_v35 }
 0x33d   :  { %646 = vrot.lane.b32.xlu1 %v1802_v36, %s1550_s9 }
 0x397   :  { %v641_v37 = vpop.permute.xlu0 %640 }
 0x398   :  { %644 = vst.msk [vmem:[%s1921_s15] sm:$0x1] %vm643_vm15, %v641_v37  ;;  %1202 = vmatmul.msk.f32.vlgmr.msra.gmra.mxu3 %vm316_vm13, %v641_v37 }
 0x399   :  { %943 = vmatpush.msra.mxu3 %v1736_v8 }
 0x39b   :  { %944 = vmatpush.msra.mxu3 %v1740_v10 }
 0x39d   :  { %945 = vmatpush.msra.mxu3 %v1743_v12 }
 0x39f   :  { %946 = vmatpush.msra.mxu3 %v1746_v13 }
 0x3af   :  { %v647_v39 = vpop.permute.xlu1 %646 }
 0x3b0   :  { %649 = vst.msk [vmem:[%s1922_s16 + $0x3] sm:$0x1] %vm643_vm15, %v647_v39  ;;  %1205 = vmatmul.msk.f32.vlgmr.msrb.gmra.mxu3 %vm316_vm13, %v647_v39 }
 0x3b1   :  { %1115 = vmatpush.msrb.mxu3 %v1736_v8  ;;  %v671_v8 = vadd.f32 %v1788_v42, %v670_v45 }
 0x3b3   :  { %1116 = vmatpush.msrb.mxu3 %v1740_v10  ;;  %v755_v10 = vadd.f32 %v1791_v49, %v754_v46 }
 0x3b5   :  { %1117 = vmatpush.msrb.mxu3 %v1743_v12 }
 0x3b7   :  { %1118 = vmatpush.msrb.mxu3 %v1746_v13 }
 0x41b   :  { %v692_v40 = vpop.f32.mrf.mxu3 }
 0x41c   :  { %v693_v41 = vadd.f32 %v1770_v31, %v692_v40 }
 0x41e   :  { %716 = vrot.lane.b32.xlu0 %v693_v41, %s1549_s6  ;;  %v695_v47 = vadd.f32 %v693_v41, %v671_v8 }
 0x420   :  { %v1203_v48 = vmul.f32 -1.442695, %v695_v47  ;;  %v926_v47 = vpop.f32.mrf.mxu2 }
 0x422   :  { %1274 = vpow2.f32 %v1203_v48  ;;  %v927_v48 = vadd.f32 %v1791_v49, %v926_v47 }
 0x428   :  { %v1275_v50 = vpop.eup %1274  ;;  %v1098_v47 = vpop.f32.mrf.mxu2 }
 0x429   :  { %v699_v52 = vadd.f32 1.0, %v1275_v50 }
 0x42b   :  { %vm705_vm2 = vweird.f32 %v699_v52  ;;  %v711_v0 = vand.u32 2147483648, %v699_v52  ;;  %v709_v2 = vand.u32 2147483647, %v699_v52 }
 0x42d   :  { %v712_v6 = vor.u32 1.1754944e-38, %v711_v0  ;;  %vm710_vm6 = vcmp.eq.f32.partialorder %v709_v2, 8.507059e+37 }
 0x433   :  { %v776_v43 = vpop.f32.mrf.mxu3 }
 0x434   :  { %v777_v44 = vadd.f32 %v1777_v38, %v776_v43  ;;  %v845_v43 = vpop.f32.mrf.mxu0 }
 0x436   :  { %800 = vrot.lane.b32.xlu2 %v777_v44, %s1549_s6  ;;  %v779_v12 = vadd.f32 %v777_v44, %v755_v10  ;;  %v846_v44 = vadd.f32 %v1788_v42, %v845_v43 }
 0x438   :  { %v1206_v13 = vmul.f32 -1.442695, %v779_v12 }
 0x43a   :  { %1276 = vpow2.f32 %v1206_v13 }
 0x43b   :  { %1278 = vrcp.f32 %v699_v52 }
 0x440   :  { %v1277_v51 = vpop.eup %1276 }
 0x441   :  { %v783_v53 = vadd.f32 1.0, %v1277_v51  ;;  %v1279_v54 = vpop.eup %1278 }
 0x442   :  { %v701_v56 = vmul.f32 %v1279_v54, %v699_v52  ;;  %vm706_vm0 = vweird.f32 %v1279_v54 }
 0x443   :  { %1280 = vrcp.f32 %v783_v53  ;;  %v795_v1 = vand.u32 2147483648, %v783_v53  ;;  %vm707_vm3 = vmor %vm705_vm2, %vm706_vm0  ;;  %vm789_vm4 = vweird.f32 %v783_v53  ;;  %v793_v3 = vand.u32 2147483647, %v783_v53 }
 0x444   :  { %v702_v58 = vsub.f32 1.0, %v701_v56 }
 0x445   :  { %v796_v7 = vor.u32 1.1754944e-38, %v795_v1  ;;  %vm794_vm7 = vcmp.eq.f32.partialorder %v793_v3, 8.507059e+37 }
 0x446   :  { %v703_v60 = vmul.f32 %v1279_v54, %v702_v58 }
 0x448   :  { %v704_v62 = vadd.f32 %v1279_v54, %v703_v60 }
 0x449   :  { %v1281_v55 = vpop.eup %1280 }
 0x44a   :  { %v785_v57 = vmul.f32 %v1281_v55, %v783_v53  ;;  %vm790_vm1 = vweird.f32 %v1281_v55  ;;  %v708_v4 = vsel %vm707_vm3, %v1279_v54, %v704_v62 }
 0x44b   :  { %vm791_vm5 = vmor %vm789_vm4, %vm790_vm1  ;;  %v713_v11 = vsel %vm710_vm6, %v712_v6, %v708_v4 }
 0x44c   :  { %v786_v59 = vsub.f32 1.0, %v785_v57  ;;  %v726_v24 = vsub.f32 1.0, %v713_v11  ;;  %v732_v26 = vmul.f32 %v713_v11, %v1798_v30 }
 0x44e   :  { %v787_v61 = vmul.f32 %v1281_v55, %v786_v59 }
 0x450   :  { %v788_v63 = vadd.f32 %v1281_v55, %v787_v61 }
 0x452   :  { %v792_v5 = vsel %vm791_vm5, %v1281_v55, %v788_v63 }
 0x453   :  { %v797_v15 = vsel %vm794_vm7, %v796_v7, %v792_v5 }
 0x454   :  { %v810_v29 = vsub.f32 1.0, %v797_v15  ;;  %v816_v33 = vmul.f32 %v797_v15, %v1802_v36 }
 0x490   :  { %v717_v9 = vpop.permute.xlu0 %716  ;;  %v801_v14 = vpop.permute.xlu2 %800 }
 0x491   :  { %v719_v16 = vmul.f32 %v717_v9, %v713_v11  ;;  %v803_v17 = vmul.f32 %v801_v14, %v797_v15 }
 0x493   :  { %721 = vrot.lane.b32.xlu2 %v719_v16, %s1549_s6  ;;  %805 = vrot.lane.b32.xlu1 %v803_v17, %s1549_s6 }
 0x4ed   :  { %v722_v18 = vpop.permute.xlu2 %721 }
 0x4ee   :  { %v724_v19 = vadd.f32 %v722_v18, %v671_v8 }
 0x4f0   :  { %1282 = vtanh.f32 %v724_v19 }
 0x4f6   :  { %v1283_v20 = vpop.eup %1282 }
 0x4f7   :  { %728 = vrot.lane.b32.xlu1 %v1283_v20, %s1550_s9 }
 0x505   :  { %v806_v21 = vpop.permute.xlu1 %805 }
 0x506   :  { %v808_v22 = vadd.f32 %v806_v21, %v755_v10 }
 0x508   :  { %1284 = vtanh.f32 %v808_v22 }
 0x50e   :  { %v1285_v23 = vpop.eup %1284 }
 0x50f   :  { %812 = vrot.lane.b32.xlu0 %v1285_v23, %s1550_s9 }
 0x569   :  { %v729_v25 = vpop.permute.xlu1 %728 }
 0x56a   :  { %v731_v27 = vmul.f32 %v729_v25, %v726_v24 }
 0x56c   :  { %v1835_v28 = vadd.f32 %v732_v26, %v731_v27 }
 0x56e   :  { %819 = vrot.lane.b32.xlu0 %v1835_v28, %s1550_s9 }
 0x581   :  { %v813_v32 = vpop.permute.xlu0 %812 }
 0x582   :  { %v815_v34 = vmul.f32 %v813_v32, %v810_v29 }
 0x584   :  { %v1840_v35 = vadd.f32 %v816_v33, %v815_v34 }
 0x586   :  { %824 = vrot.lane.b32.xlu2 %v1840_v35, %s1550_s9 }
 0x5e0   :  { %v825_v37 = vpop.permute.xlu2 %824  ;;  %v820_v39 = vpop.permute.xlu0 %819 }
 0x5e1   :  { %827 = vst.msk [vmem:[%s1922_s16 + $0x2] sm:$0x1] %vm643_vm15, %v825_v37  ;;  %1208 = vmatmul.msk.f32.vlgmr.msrb.gmra.mxu1 %vm316_vm13, %v820_v39  ;;  %1211 = vmatmul.msk.f32.vlgmr.msra.gmra.mxu3 %vm316_vm13, %v825_v37 }
 0x5e2   :  { %822 = vst.msk [vmem:[%s1921_s15 + $0x1] sm:$0x1] %vm643_vm15, %v820_v39 }
 0x65e   :  { %v867_v30 = vpop.f32.mrf.mxu1 }
 0x65f   :  { %v868_v36 = vadd.f32 %v1770_v31, %v867_v30 }
 0x661   :  { %891 = vrot.lane.b32.xlu2 %v868_v36, %s1549_s6  ;;  %v870_v45 = vadd.f32 %v868_v36, %v846_v44 }
 0x663   :  { %v1209_v46 = vmul.f32 -1.442695, %v870_v45 }
 0x664   :  { %v948_v40 = vpop.f32.mrf.mxu3 }
 0x665   :  { %v949_v41 = vadd.f32 %v1777_v38, %v948_v40  ;;  %1286 = vpow2.f32 %v1209_v46  ;;  %v1017_v40 = vpop.f32.mrf.mxu0 }
 0x667   :  { %972 = vrot.lane.b32.xlu1 %v949_v41, %s1549_s6  ;;  %v951_v13 = vadd.f32 %v949_v41, %v927_v48  ;;  %v1018_v41 = vadd.f32 %v1788_v42, %v1017_v40 }
 0x669   :  { %v1212_v51 = vmul.f32 -1.442695, %v951_v13 }
 0x66b   :  { %v1287_v8 = vpop.eup %1286 }
 0x66c   :  { %v874_v10 = vadd.f32 1.0, %v1287_v8 }
 0x66e   :  { %1288 = vrcp.f32 %v874_v10  ;;  %v886_v55 = vand.u32 2147483648, %v874_v10  ;;  %vm880_vm9 = vweird.f32 %v874_v10  ;;  %v884_v57 = vand.u32 2147483647, %v874_v10 }
 0x66f   :  { %1290 = vpow2.f32 %v1212_v51 }
 0x670   :  { %v887_v60 = vor.u32 1.1754944e-38, %v886_v55  ;;  %vm885_vm11 = vcmp.eq.f32.partialorder %v884_v57, 8.507059e+37 }
 0x674   :  { %v1289_v12 = vpop.eup %1288 }
 0x675   :  { %v876_v50 = vmul.f32 %v1289_v12, %v874_v10  ;;  %vm881_vm8 = vweird.f32 %v1289_v12  ;;  %v1291_v56 = vpop.eup %1290 }
 0x676   :  { %vm882_vm10 = vmor %vm880_vm9, %vm881_vm8  ;;  %v955_v59 = vadd.f32 1.0, %v1291_v56 }
 0x677   :  { %v877_v52 = vsub.f32 1.0, %v876_v50 }
 0x678   :  { %1292 = vrcp.f32 %v955_v59  ;;  %v967_v5 = vand.u32 2147483648, %v955_v59  ;;  %vm961_vm14 = vweird.f32 %v955_v59  ;;  %v965_v6 = vand.u32 2147483647, %v955_v59 }
 0x679   :  { %v878_v53 = vmul.f32 %v1289_v12, %v877_v52 }
 0x67a   :  { %v968_v9 = vor.u32 1.1754944e-38, %v967_v5  ;;  %vm966_vm1 = vcmp.eq.f32.partialorder %v965_v6, 8.507059e+37 }
 0x67b   :  { %v879_v54 = vadd.f32 %v1289_v12, %v878_v53 }
 0x67d   :  { %v883_v58 = vsel %vm882_vm10, %v1289_v12, %v879_v54 }
 0x67e   :  { %v888_v62 = vsel %vm885_vm11, %v887_v60, %v883_v58  ;;  %v1293_v0 = vpop.eup %1292 }
 0x67f   :  { %v957_v1 = vmul.f32 %v1293_v0, %v955_v59  ;;  %vm962_vm12 = vweird.f32 %v1293_v0  ;;  %v901_v22 = vsub.f32 1.0, %v888_v62  ;;  %v907_v24 = vmul.f32 %v888_v62, %v1835_v28 }
 0x680   :  { %vm963_vm0 = vmor %vm961_vm14, %vm962_vm12 }
 0x681   :  { %v958_v2 = vsub.f32 1.0, %v957_v1 }
 0x683   :  { %v959_v3 = vmul.f32 %v1293_v0, %v958_v2 }
 0x685   :  { %v960_v4 = vadd.f32 %v1293_v0, %v959_v3 }
 0x687   :  { %v964_v7 = vsel %vm963_vm0, %v1293_v0, %v960_v4 }
 0x688   :  { %v969_v11 = vsel %vm966_vm1, %v968_v9, %v964_v7 }
 0x689   :  { %v982_v27 = vsub.f32 1.0, %v969_v11  ;;  %v988_v32 = vmul.f32 %v969_v11, %v1840_v35 }
 0x6bb   :  { %v892_v61 = vpop.permute.xlu2 %891 }
 0x6bc   :  { %v894_v63 = vmul.f32 %v892_v61, %v888_v62 }
 0x6be   :  { %896 = vrot.lane.b32.xlu1 %v894_v63, %s1549_s6 }
 0x6d9   :  { %v973_v14 = vpop.permute.xlu1 %972 }
 0x6da   :  { %v975_v15 = vmul.f32 %v973_v14, %v969_v11 }
 0x6dc   :  { %977 = vrot.lane.b32.xlu0 %v975_v15, %s1549_s6 }
 0x730   :  { %v897_v16 = vpop.permute.xlu1 %896 }
 0x731   :  { %v899_v17 = vadd.f32 %v897_v16, %v846_v44 }
 0x733   :  { %1294 = vtanh.f32 %v899_v17 }
 0x739   :  { %v1295_v18 = vpop.eup %1294 }
 0x73a   :  { %903 = vrot.lane.b32.xlu0 %v1295_v18, %s1550_s9 }
 0x74e   :  { %v978_v19 = vpop.permute.xlu0 %977 }
 0x74f   :  { %v980_v20 = vadd.f32 %v978_v19, %v927_v48 }
 0x751   :  { %1296 = vtanh.f32 %v980_v20 }
 0x757   :  { %v1297_v21 = vpop.eup %1296 }
 0x758   :  { %984 = vrot.lane.b32.xlu2 %v1297_v21, %s1550_s9 }
 0x7ac   :  { %v904_v23 = vpop.permute.xlu0 %903 }
 0x7ad   :  { %v906_v25 = vmul.f32 %v904_v23, %v901_v22 }
 0x7af   :  { %v1865_v26 = vadd.f32 %v907_v24, %v906_v25 }
 0x7b1   :  { %991 = vrot.lane.b32.xlu2 %v1865_v26, %s1550_s9 }
 0x7b2   :  { %v985_v29 = vpop.permute.xlu2 %984 }
 0x7b3   :  { %v987_v33 = vmul.f32 %v985_v29, %v982_v27 }
 0x7b5   :  { %v1870_v34 = vadd.f32 %v988_v32, %v987_v33 }
 0x7b7   :  { %996 = vrot.lane.b32.xlu1 %v1870_v34, %s1550_s9 }
 0x80b   :  { %v992_v37 = vpop.permute.xlu2 %991 }
 0x80c   :  { %994 = vst.msk [vmem:[%s1921_s15 + $0x2] sm:$0x1] %vm643_vm15, %v992_v37  ;;  %1214 = vmatmul.msk.f32.vlgmr.msra.gmra.mxu1 %vm316_vm13, %v992_v37 }
 0x829   :  { %v997_v28 = vpop.permute.xlu1 %996 }
 0x82a   :  { %999 = vst.msk [vmem:[%s1922_s16 + $0x1] sm:$0x1] %vm643_vm15, %v997_v28  ;;  %1217 = vmatmul.msk.f32.vlgmr.msrb.gmra.mxu3 %vm316_vm13, %v997_v28 }
 0x889   :  { %v1039_v35 = vpop.f32.mrf.mxu1 }
 0x88a   :  { %v1040_v39 = vadd.f32 %v1770_v31, %v1039_v35  ;;  %v1099_v31 = vadd.f32 %v1791_v49, %v1098_v47 }
 0x88c   :  { %1063 = vrot.lane.b32.xlu0 %v1040_v39, %s1549_s6  ;;  %v1042_v43 = vadd.f32 %v1040_v39, %v1018_v41 }
 0x88e   :  { %v1215_v44 = vmul.f32 -1.442695, %v1042_v43 }
 0x890   :  { %1298 = vpow2.f32 %v1215_v44 }
 0x896   :  { %v1299_v45 = vpop.eup %1298 }
 0x897   :  { %v1046_v46 = vadd.f32 1.0, %v1299_v45 }
 0x899   :  { %1300 = vrcp.f32 %v1046_v46  ;;  %v1058_v51 = vand.u32 2147483648, %v1046_v46  ;;  %vm1052_vm2 = vweird.f32 %v1046_v46  ;;  %v1056_v42 = vand.u32 2147483647, %v1046_v46 }
 0x89b   :  { %v1059_v53 = vor.u32 1.1754944e-38, %v1058_v51  ;;  %vm1057_vm4 = vcmp.eq.f32.partialorder %v1056_v42, 8.507059e+37 }
 0x89f   :  { %v1301_v8 = vpop.eup %1300 }
 0x8a0   :  { %v1048_v10 = vmul.f32 %v1301_v8, %v1046_v46  ;;  %vm1053_vm13 = vweird.f32 %v1301_v8 }
 0x8a1   :  { %vm1054_vm3 = vmor %vm1052_vm2, %vm1053_vm13 }
 0x8a2   :  { %v1049_v12 = vsub.f32 1.0, %v1048_v10 }
 0x8a4   :  { %v1050_v13 = vmul.f32 %v1301_v8, %v1049_v12 }
 0x8a6   :  { %v1051_v50 = vadd.f32 %v1301_v8, %v1050_v13 }
 0x8a8   :  { %v1055_v52 = vsel %vm1054_vm3, %v1301_v8, %v1051_v50 }
 0x8a9   :  { %v1060_v55 = vsel %vm1057_vm4, %v1059_v53, %v1055_v52 }
 0x8aa   :  { %v1073_v16 = vsub.f32 1.0, %v1060_v55  ;;  %v1079_v18 = vmul.f32 %v1060_v55, %v1865_v26 }
 0x8ad   :  { %v1120_v30 = vpop.f32.mrf.mxu3 }
 0x8ae   :  { %v1121_v36 = vadd.f32 %v1777_v38, %v1120_v30 }
 0x8b0   :  { %1144 = vrot.lane.b32.xlu1 %v1121_v36, %s1549_s6  ;;  %v1123_v48 = vadd.f32 %v1121_v36, %v1099_v31 }
 0x8b2   :  { %v1218_v38 = vmul.f32 -1.442695, %v1123_v48 }
 0x8b4   :  { %1302 = vpow2.f32 %v1218_v38 }
 0x8ba   :  { %v1303_v56 = vpop.eup %1302 }
 0x8bb   :  { %v1127_v49 = vadd.f32 1.0, %v1303_v56 }
 0x8bd   :  { %1304 = vrcp.f32 %v1127_v49  ;;  %v1139_v63 = vand.u32 2147483648, %v1127_v49  ;;  %vm1133_vm6 = vweird.f32 %v1127_v49  ;;  %v1137_v0 = vand.u32 2147483647, %v1127_v49 }
 0x8bf   :  { %v1140_v2 = vor.u32 1.1754944e-38, %v1139_v63  ;;  %vm1138_vm8 = vcmp.eq.f32.partialorder %v1137_v0, 8.507059e+37 }
 0x8c3   :  { %v1305_v58 = vpop.eup %1304 }
 0x8c4   :  { %v1129_v59 = vmul.f32 %v1305_v58, %v1127_v49  ;;  %vm1134_vm5 = vweird.f32 %v1305_v58 }
 0x8c5   :  { %vm1135_vm7 = vmor %vm1133_vm6, %vm1134_vm5 }
 0x8c6   :  { %v1130_v60 = vsub.f32 1.0, %v1129_v59 }
 0x8c8   :  { %v1131_v61 = vmul.f32 %v1305_v58, %v1130_v60 }
 0x8ca   :  { %v1132_v62 = vadd.f32 %v1305_v58, %v1131_v61 }
 0x8cc   :  { %v1136_v1 = vsel %vm1135_vm7, %v1305_v58, %v1132_v62 }
 0x8cd   :  { %v1141_v4 = vsel %vm1138_vm8, %v1140_v2, %v1136_v1 }
 0x8ce   :  { %v1154_v21 = vsub.f32 1.0, %v1141_v4  ;;  %v1160_v23 = vmul.f32 %v1141_v4, %v1870_v34 }
 0x8fe   :  { %v1064_v54 = vpop.permute.xlu0 %1063 }
 0x8ff   :  { %v1066_v57 = vmul.f32 %v1064_v54, %v1060_v55 }
 0x901   :  { %1068 = vrot.lane.b32.xlu2 %v1066_v57, %s1549_s6 }
 0x922   :  { %v1145_v3 = vpop.permute.xlu1 %1144 }
 0x923   :  { %v1147_v5 = vmul.f32 %v1145_v3, %v1141_v4 }
 0x925   :  { %1149 = vrot.lane.b32.xlu0 %v1147_v5, %s1549_s6 }
 0x95b   :  { %v1069_v6 = vpop.permute.xlu2 %1068 }
 0x95c   :  { %v1071_v7 = vadd.f32 %v1069_v6, %v1018_v41 }
 0x95e   :  { %1306 = vtanh.f32 %v1071_v7 }
 0x964   :  { %v1307_v9 = vpop.eup %1306 }
 0x965   :  { %1075 = vrot.lane.b32.xlu1 %v1307_v9, %s1550_s9 }
 0x997   :  { %v1150_v11 = vpop.permute.xlu0 %1149 }
 0x998   :  { %v1152_v14 = vadd.f32 %v1150_v11, %v1099_v31 }
 0x99a   :  { %1308 = vtanh.f32 %v1152_v14 }
 0x9a0   :  { %v1309_v15 = vpop.eup %1308 }
 0x9a1   :  { %1156 = vrot.lane.b32.xlu2 %v1309_v15, %s1550_s9 }
 0x9d7   :  { %v1076_v17 = vpop.permute.xlu1 %1075 }
 0x9d8   :  { %v1078_v19 = vmul.f32 %v1076_v17, %v1073_v16 }
 0x9da   :  { %v1080_v20 = vadd.f32 %v1079_v18, %v1078_v19 }
 0x9dc   :  { %1163 = vrot.lane.b32.xlu0 %v1080_v20, %s1550_s9 }
 0x9fb   :  { %v1157_v22 = vpop.permute.xlu2 %1156 }
 0x9fc   :  { %v1159_v24 = vmul.f32 %v1157_v22, %v1154_v21 }
 0x9fe   :  { %v1161_v25 = vadd.f32 %v1160_v23, %v1159_v24 }
 0xa00   :  { %1168 = vrot.lane.b32.xlu1 %v1161_v25, %s1550_s9 }
 0xa4e   :  { %v1164_v27 = vpop.permute.xlu0 %1163 }
 0xa4f   :  { %1166 = vst.msk [vmem:[%s1921_s15 + $0x3] sm:$0x1] %vm643_vm15, %v1164_v27 }
 0xa72   :  { %v1169_v29 = vpop.permute.xlu1 %1168 }
 0xa73   :  { %1171 = vst.msk [vmem:[%s1922_s16] sm:$0x1] %vm643_vm15, %v1169_v29 }
 0xa74   :  { %1180 = vsyncpa [#allocation3], 1 }
 0xa75   :  { %1181 = vsyncpa [#allocation5], 1 }
 0xa76   :  { %1182 = vsyncpa [#allocation8], 1 }
 0xa77   :  { %1183 = vsyncpa [#allocation11], 1 }
 0xa78   :  { %1184 = vsyncpa [#allocation14], 1 }

</bundles_post_ra>
